<compile_context>
chip_gen: v5e
topology: v5e:2x2
jax: 0.10.0
libtpu: 0.0.40
codegen_flags: <defaults>
</compile_context>

<pallas_src>
import jax
import jax.numpy as jnp
from jax.experimental import pallas as pl
from jax.experimental.pallas import tpu as pltpu

NEG_SLOPE = 0.01   # F.leaky_relu default negative_slope
FPAD = 8           # padded feature (sublane) width carried between conv stages
LANE = 128


def _leaky_relu(v):
    return jnp.where(v >= 0, v, NEG_SLOPE * v)


def _round_up(a, b):
    return ((a + b - 1) // b) * b


def _pick_tile(n_pad, cap):
    """Largest multiple of 128 that is <= cap and divides n_pad."""
    t = min(cap, n_pad)
    t -= t % LANE
    t = max(t, LANE)
    while n_pad % t != 0:
        t -= LANE
    return t


def _vmem_capacity_bytes():
    try:
        info = pltpu.get_tpu_info()
        cap = getattr(info, "vmem_capacity_bytes", None)
        if cap:
            return int(cap)
    except Exception:
        pass
    return 64 * 1024 * 1024   # conservative fallback (v7x per-core)


# --------------------------- adjacency construction ------------------------

def build_norm_adj_t(edge_index, n_nodes, n_pad, dtype):
    """Transposed symmetric-normalized adjacency (A_norm^T) with remaining
    self-loops, built at padded size directly in `dtype` (no f32 N_pad^2
    staging copy).  Matches PyG gcn_norm / add_remaining_self_loops."""
    src = edge_index[0]
    dst = edge_index[1]

    # At[j, i] = #edges j -> i   (At = A^T; no symmetry assumption).
    at = (jnp.zeros((n_pad, n_pad), dtype)
          .at[src, dst].add(jnp.ones(src.shape, dtype)))
    idx = jnp.arange(n_nodes)
    diag = at[idx, idx]
    at = at.at[idx, idx].set(jnp.where(diag > 0, diag, jnp.ones_like(diag)))

    # In-degree (incl. self loops) computed from the edge list (stays 1-D).
    deg = jnp.zeros((n_pad,), jnp.float32).at[dst].add(1.0)
    self_cnt = (jnp.zeros((n_pad,), jnp.float32)
                .at[dst].add((src == dst).astype(jnp.float32)))
    is_real = jnp.arange(n_pad) < n_nodes
    deg = deg + jnp.where(is_real & (self_cnt == 0), 1.0, 0.0)
    dinv = jnp.where(deg > 0, jax.lax.rsqrt(deg), 0.0).astype(dtype)

    # D^-1/2 A^T D^-1/2 as two broadcast multiplies (never leaves `dtype`).
    at = at * dinv[None, :]
    at = at * dinv[:, None]
    return at


# ------------------------------ Pallas kernels ------------------------------

def fused_kernel(at_ref, x0t_ref, wf1_ref, bf1_ref, wf2_ref, bf2_ref, b3_ref,
                 wl1_ref, bl1_ref, wl2_ref, bl2_ref, wl3_ref, bl3_ref, o_ref):
    """A resident in VMEM (read from HBM once); all three GCN aggregations and
    the fused MLP head in one invocation.  Everything is in transposed [F, N]
    layout so the N dimension stays on lanes."""
    at = at_ref[...]                                              # [Np, Np] bf16

    # stage 1: Y1^T = (W1 W2)^T (x0^T A^T) + (b1 W2)^T
    h = jnp.dot(x0t_ref[...], at, preferred_element_type=jnp.float32)
    y = jnp.dot(wf1_ref[...], h, preferred_element_type=jnp.float32) + bf1_ref[...]
    # stage 2: Y2^T = W3^T (Y1^T A^T) + (b2 W3)^T
    h = jnp.dot(y.astype(jnp.bfloat16), at, preferred_element_type=jnp.float32)
    y = jnp.dot(wf2_ref[...], h, preferred_element_type=jnp.float32) + bf2_ref[...]
    # stage 3: H3^T = Y2^T A^T + b3^T
    h = jnp.dot(y.astype(jnp.bfloat16), at,
                preferred_element_type=jnp.float32) + b3_ref[...]

    # fused MLP head (weights pre-cast to bf16 in the wrapper)
    z = _leaky_relu(jnp.dot(wl1_ref[...], h.astype(jnp.bfloat16),
                            preferred_element_type=jnp.float32) + bl1_ref[...])
    z = _leaky_relu(jnp.dot(wl2_ref[...], z.astype(jnp.bfloat16),
                            preferred_element_type=jnp.float32) + bl2_ref[...])
    z = _leaky_relu(jnp.dot(wl3_ref[...], z.astype(jnp.bfloat16),
                            preferred_element_type=jnp.float32) + bl3_ref[...])
    o_ref[...] = z.astype(o_ref.dtype)


def stream_stage_kernel(xt_ref, at_ref, w_ref, b_ref, o_ref, acc_ref):
    """One GCN aggregation (acc = X^T @ A^T, tiled over k) fused with the
    row-local folded affine epilogue.  Transposed layout: lane-dense output."""
    k = pl.program_id(1)

    @pl.when(k == 0)
    def _():
        acc_ref[...] = jnp.zeros_like(acc_ref)

    acc_ref[...] += jnp.dot(xt_ref[...], at_ref[...],
                            preferred_element_type=jnp.float32)

    @pl.when(k == pl.num_programs(1) - 1)
    def _():
        h = jnp.dot(w_ref[...], acc_ref[...],
                    preferred_element_type=jnp.float32) + b_ref[...]
        o_ref[...] = h.astype(o_ref.dtype)


def stream_final_kernel(xt_ref, at_ref, b3_ref, wl1_ref, bl1_ref,
                        wl2_ref, bl2_ref, wl3_ref, bl3_ref, o_ref, acc_ref):
    """Last GCN aggregation fused with the 3x (Linear + leaky_relu) MLP head."""
    k = pl.program_id(1)

    @pl.when(k == 0)
    def _():
        acc_ref[...] = jnp.zeros_like(acc_ref)

    acc_ref[...] += jnp.dot(xt_ref[...], at_ref[...],
                            preferred_element_type=jnp.float32)

    @pl.when(k == pl.num_programs(1) - 1)
    def _():
        h = acc_ref[...] + b3_ref[...]                      # conv3 out [F, TN]
        z = _leaky_relu(jnp.dot(wl1_ref[...], h.astype(jnp.bfloat16),
                                preferred_element_type=jnp.float32) + bl1_ref[...])
        z = _leaky_relu(jnp.dot(wl2_ref[...], z.astype(jnp.bfloat16),
                                preferred_element_type=jnp.float32) + bl2_ref[...])
        z = _leaky_relu(jnp.dot(wl3_ref[...], z.astype(jnp.bfloat16),
                                preferred_element_type=jnp.float32) + bl3_ref[...])
        o_ref[...] = z.astype(o_ref.dtype)


# ------------------------------ pallas_call wrappers ------------------------

def fused_call(at, x0t, wf1, bf1, wf2, bf2, b3,
               wl1, bl1, wl2, bl2, wl3, bl3, *, out_pad, vmem_limit):
    n_pad = at.shape[0]
    return pl.pallas_call(
        fused_kernel,
        out_shape=jax.ShapeDtypeStruct((out_pad, n_pad), jnp.float32),
        compiler_params=pltpu.CompilerParams(vmem_limit_bytes=vmem_limit),
    )(at, x0t, wf1, bf1, wf2, bf2, b3, wl1, bl1, wl2, bl2, wl3, bl3)


def stream_stage_call(at, xt, w_t, b_col, *, tn, tk, vmem_limit):
    n_pad = at.shape[0]
    grid = (n_pad // tn, n_pad // tk)
    return pl.pallas_call(
        stream_stage_kernel,
        out_shape=jax.ShapeDtypeStruct((FPAD, n_pad), jnp.bfloat16),
        grid_spec=pltpu.PrefetchScalarGridSpec(
            num_scalar_prefetch=0, grid=grid,
            in_specs=[
                pl.BlockSpec((FPAD, tk), lambda j, k: (0, k)),     # X^T tile
                pl.BlockSpec((tk, tn), lambda j, k: (k, j)),       # A^T tile
                pl.BlockSpec((FPAD, FPAD), lambda j, k: (0, 0)),   # folded W^T
                pl.BlockSpec((FPAD, 1), lambda j, k: (0, 0)),      # bias column
            ],
            out_specs=pl.BlockSpec((FPAD, tn), lambda j, k: (0, j)),
            scratch_shapes=[pltpu.VMEM((FPAD, tn), jnp.float32)]),
        compiler_params=pltpu.CompilerParams(
            dimension_semantics=("parallel", "arbitrary"),
            vmem_limit_bytes=vmem_limit),
    )(xt, at, w_t, b_col)


def stream_final_call(at, xt, b3, wl1, bl1, wl2, bl2, wl3, bl3,
                      *, tn, tk, out_pad, vmem_limit):
    n_pad = at.shape[0]
    l1 = wl1.shape[0]
    l2 = wl2.shape[0]
    grid = (n_pad // tn, n_pad // tk)
    return pl.pallas_call(
        stream_final_kernel,
        out_shape=jax.ShapeDtypeStruct((out_pad, n_pad), jnp.float32),
        grid_spec=pltpu.PrefetchScalarGridSpec(
            num_scalar_prefetch=0, grid=grid,
            in_specs=[
                pl.BlockSpec((FPAD, tk), lambda j, k: (0, k)),     # X2^T tile
                pl.BlockSpec((tk, tn), lambda j, k: (k, j)),       # A^T tile
                pl.BlockSpec((FPAD, 1), lambda j, k: (0, 0)),      # b3 column
                pl.BlockSpec((l1, FPAD), lambda j, k: (0, 0)),     # W_l1^T (bf16)
                pl.BlockSpec((l1, 1), lambda j, k: (0, 0)),        # b_l1 column
                pl.BlockSpec((l2, l1), lambda j, k: (0, 0)),       # W_l2^T (bf16)
                pl.BlockSpec((l2, 1), lambda j, k: (0, 0)),        # b_l2 column
                pl.BlockSpec((out_pad, l2), lambda j, k: (0, 0)),  # W_l3^T (bf16)
                pl.BlockSpec((out_pad, 1), lambda j, k: (0, 0)),   # b_l3 column
            ],
            out_specs=pl.BlockSpec((out_pad, tn), lambda j, k: (0, j)),
            scratch_shapes=[pltpu.VMEM((FPAD, tn), jnp.float32)]),
        compiler_params=pltpu.CompilerParams(
            dimension_semantics=("parallel", "arbitrary"),
            vmem_limit_bytes=vmem_limit),
    )(xt, at, b3, wl1, bl1, wl2, bl2, wl3, bl3)


# ----------------------------------- forward --------------------------------

def init_params(key, in_channels, out_channels, n_atoms):
    e1, e2, e3 = 9, 3, 3
    l1, l2 = 512, 128
    shapes = {
        "w_inv": (in_channels, n_atoms), "b_inv": (1, n_atoms),
        "w_c1": (1, e1), "b_c1": (1, e1),
        "w_c2": (e1, e2), "b_c2": (1, e2),
        "w_c3": (e2, e3), "b_c3": (1, e3),
        "w_l1": (e3, l1), "b_l1": (1, l1),
        "w_l2": (l1, l2), "b_l2": (1, l2),
        "w_l3": (l2, out_channels), "b_l3": (1, out_channels),
    }
    params = {}
    keys = jax.random.split(key, len(shapes))
    for k_rng, (name, shp) in zip(keys, sorted(shapes.items())):
        fan_in = shp[0] if name.startswith("w") else 1
        scale = 1.0 / jnp.sqrt(jnp.float32(fan_in))
        params[name] = scale * jax.random.normal(k_rng, shp, jnp.float32)
    return params


def variational_gcn_decoder_forward(x, edge_index, params, n_atoms, out_channels):
    # --- inv_transform Linear + leaky_relu + reshape: tiny, left to XLA ---
    h = _leaky_relu(x @ params["w_inv"] + params["b_inv"])            # [M, n_atoms]
    n_nodes = h.shape[0] * h.shape[1]
    x0 = h.reshape(-1)                                                # [N]

    n_pad = _round_up(n_nodes, LANE)        # pad only to a lane multiple
    out_pad = _round_up(out_channels, 8)    # sublane dim in transposed layout
    e = params["w_c3"].shape[1]             # 3
    l1 = params["w_l1"].shape[1]            # 512
    l2 = params["w_l2"].shape[1]            # 128
    f32 = jnp.float32

    # --- normalized transposed adjacency, padded, built directly in bf16 ---
    at = build_norm_adj_t(edge_index, n_nodes, n_pad, jnp.bfloat16)

    # --- transposed, lane-dense feature carrier [F, N] ---
    x0t = (jnp.zeros((FPAD, n_pad), jnp.bfloat16)
           .at[0, :n_nodes].set(x0.astype(jnp.bfloat16)))

    # --- fold the conv weight chain (no nonlinearity between GCN layers) ---
    w12 = params["w_c1"] @ params["w_c2"]          # [1, 3]
    b12 = params["b_c1"] @ params["w_c2"]          # [1, 3]
    w3 = params["w_c3"]                            # [3, 3]
    b23 = params["b_c2"] @ params["w_c3"]          # [1, 3]

    wf1t = jnp.zeros((FPAD, FPAD), f32).at[:e, :1].set(w12.T)
    bf1c = jnp.zeros((FPAD, 1), f32).at[:e, 0].set(b12[0])
    wf2t = jnp.zeros((FPAD, FPAD), f32).at[:e, :e].set(w3.T)
    bf2c = jnp.zeros((FPAD, 1), f32).at[:e, 0].set(b23[0])
    b3c = jnp.zeros((FPAD, 1), f32).at[:e, 0].set(params["b_c3"][0])

    # --- MLP head weights: transposed + pre-cast to bf16 in the wrapper ---
    wl1t = (jnp.zeros((l1, FPAD), jnp.bfloat16)
            .at[:, :e].set(params["w_l1"].T.astype(jnp.bfloat16)))
    bl1c = params["b_l1"].T.astype(f32)                       # [512, 1]
    wl2t = params["w_l2"].T.astype(jnp.bfloat16)              # [128, 512]
    bl2c = params["b_l2"].T.astype(f32)                       # [128, 1]
    wl3t = (jnp.zeros((out_pad, l2), jnp.bfloat16)
            .at[:out_channels, :].set(params["w_l3"].T.astype(jnp.bfloat16)))
    bl3c = (jnp.zeros((out_pad, 1), f32)
            .at[:out_channels, 0].set(params["b_l3"][0]))

    # --- generation-aware VMEM budget; read A once when it fits ---
    cap = _vmem_capacity_bytes()
    fused_limit = max(32 << 20, min(cap - (8 << 20), 120 << 20))
    a_bytes = 2 * n_pad * n_pad
    act_bytes = 4 * n_pad * (l1 + l2 + out_pad + 8 * FPAD)
    use_fused = (a_bytes + act_bytes) <= int(0.7 * fused_limit)

    if use_fused:
        out_t = fused_call(at, x0t, wf1t, bf1c, wf2t, bf2c, b3c,
                           wl1t, bl1c, wl2t, bl2c, wl3t, bl3c,
                           out_pad=out_pad, vmem_limit=fused_limit)
    else:
        stream_limit = max(32 << 20, min(cap // 2, 64 << 20))
        tn = _pick_tile(n_pad, 512)
        tk = _pick_tile(n_pad, 2048 if cap >= (96 << 20) else 1024)
        x1t = stream_stage_call(at, x0t, wf1t, bf1c,
                                tn=tn, tk=tk, vmem_limit=stream_limit)
        x2t = stream_stage_call(at, x1t, wf2t, bf2c,
                                tn=tn, tk=tk, vmem_limit=stream_limit)
        out_t = stream_final_call(at, x2t, b3c, wl1t, bl1c, wl2t, bl2c,
                                  wl3t, bl3c, tn=tn, tk=tk, out_pad=out_pad,
                                  vmem_limit=stream_limit)

    out = out_t[:out_channels, :n_nodes].T                    # [N, out_channels]
    return out, edge_index


# --------------------------- pure-JAX f32 reference --------------------------

def _reference_forward(x, edge_index, params):
    h = _leaky_relu(x @ params["w_inv"] + params["b_inv"])
    n = h.shape[0] * h.shape[1]
    x0 = h.reshape(n, 1)
    src, dst = edge_index[0], edge_index[1]
    a = jnp.zeros((n, n), jnp.float32).at[dst, src].add(1.0)
    idx = jnp.arange(n)
    diag = a[idx, idx]
    a = a.at[idx, idx].set(jnp.where(diag > 0, diag, 1.0))
    deg = a.sum(axis=1)
    dinv = jnp.where(deg > 0, 1.0 / jnp.sqrt(deg), 0.0)
    a = dinv[:, None] * a * dinv[None, :]
    x1 = a @ (x0 @ params["w_c1"]) + params["b_c1"]
    x2 = a @ (x1 @ params["w_c2"]) + params["b_c2"]
    x3 = a @ (x2 @ params["w_c3"]) + params["b_c3"]
    z = _leaky_relu(x3 @ params["w_l1"] + params["b_l1"])
    z = _leaky_relu(z @ params["w_l2"] + params["b_l2"])
    z = _leaky_relu(z @ params["w_l3"] + params["b_l3"])
    return z


# ---------------------------------- main -------------------------------------

if __name__ == "__main__":
    batch_size = 2
    n_atoms = 4
    in_channels = 8
    out_channels = 16

    key = jax.random.PRNGKey(0)
    k_x, k_p = jax.random.split(key)

    m = batch_size * n_atoms                      # 8 input rows
    n_nodes = m * n_atoms                         # 32 graph nodes after reshape

    x = jax.random.normal(k_x, (m, in_channels), jnp.float32)

    # deterministic ring graph over the expanded node set (both directions)
    idx = jnp.arange(n_nodes, dtype=jnp.int32)
    src = jnp.concatenate([idx, (idx + 1) % n_nodes])
    dst = jnp.concatenate([(idx + 1) % n_nodes, idx])
    edge_index = jnp.stack([src, dst], axis=0)    # [2, E]

    params = init_params(k_p, in_channels, out_channels, n_atoms)

    out, ei = variational_gcn_decoder_forward(x, edge_index, params,
                                              n_atoms, out_channels)
    out = jax.block_until_ready(out)
    assert out.shape == (n_nodes, out_channels), out.shape
    assert bool(jnp.all(jnp.isfinite(out)))

    # sanity vs a pure-f32 XLA reference (loose: A / activations are bf16)
    ref = _reference_forward(x, edge_index, params)
    err = jnp.max(jnp.abs(out - ref)) / (jnp.max(jnp.abs(ref)) + 1.0)
    assert float(err) < 0.1, float(err)

    print("KERNEL_OK")
</pallas_src>

<mosaic_0001>
module attributes {stable_mosaic.version = 11 : i64} {
  func.func @fused_kernel(%arg0: memref<128x128xbf16, #tpu.memory_space<vmem>>, %arg1: memref<8x128xbf16, #tpu.memory_space<vmem>>, %arg2: memref<8x8xf32, #tpu.memory_space<vmem>>, %arg3: memref<8x1xf32, #tpu.memory_space<vmem>>, %arg4: memref<8x8xf32, #tpu.memory_space<vmem>>, %arg5: memref<8x1xf32, #tpu.memory_space<vmem>>, %arg6: memref<8x1xf32, #tpu.memory_space<vmem>>, %arg7: memref<512x8xbf16, #tpu.memory_space<vmem>>, %arg8: memref<512x1xf32, #tpu.memory_space<vmem>>, %arg9: memref<128x512xbf16, #tpu.memory_space<vmem>>, %arg10: memref<128x1xf32, #tpu.memory_space<vmem>>, %arg11: memref<16x128xbf16, #tpu.memory_space<vmem>>, %arg12: memref<16x1xf32, #tpu.memory_space<vmem>>, %arg13: memref<16x128xf32, #tpu.memory_space<vmem>>) attributes {dimension_semantics = [], scalar_prefetch = 0 : i64, scratch_operands = 0 : i64, tpu.core_type = #tpu.core_type<tc>} {
    %c0 = arith.constant 0 : index
    %c0_0 = arith.constant 0 : index
    %0 = vector.load %arg0[%c0, %c0_0] : memref<128x128xbf16, #tpu.memory_space<vmem>>, vector<128x128xbf16>
    %c0_1 = arith.constant 0 : index
    %c0_2 = arith.constant 0 : index
    %1 = vector.load %arg1[%c0_1, %c0_2] : memref<8x128xbf16, #tpu.memory_space<vmem>>, vector<8x128xbf16>
    %cst = arith.constant dense<0.000000e+00> : vector<8x128xf32>
    %2 = tpu.matmul %1, %0, %cst {dimension_numbers = #tpu.dot_dimension_numbers<[1], [0], [0], [1], [0, 0, 1, 1], [], []>} : vector<8x128xbf16>, vector<128x128xbf16>, vector<8x128xf32> -> vector<8x128xf32>
    %c0_3 = arith.constant 0 : index
    %c0_4 = arith.constant 0 : index
    %3 = vector.load %arg2[%c0_3, %c0_4] : memref<8x8xf32, #tpu.memory_space<vmem>>, vector<8x8xf32>
    %cst_5 = arith.constant dense<0.000000e+00> : vector<8x128xf32>
    %4 = tpu.matmul %3, %2, %cst_5 {dimension_numbers = #tpu.dot_dimension_numbers<[1], [0], [0], [1], [0, 0, 1, 1], [], []>} : vector<8x8xf32>, vector<8x128xf32>, vector<8x128xf32> -> vector<8x128xf32>
    %c0_6 = arith.constant 0 : index
    %c0_7 = arith.constant 0 : index
    %5 = vector.load %arg3[%c0_6, %c0_7] : memref<8x1xf32, #tpu.memory_space<vmem>>, vector<8x1xf32>
    %6 = vector.broadcast %5 : vector<8x1xf32> to vector<8x128xf32>
    %7 = arith.addf %4, %6 : vector<8x128xf32>
    %8 = arith.truncf %7 : vector<8x128xf32> to vector<8x128xbf16>
    %cst_8 = arith.constant dense<0.000000e+00> : vector<8x128xf32>
    %9 = tpu.matmul %8, %0, %cst_8 {dimension_numbers = #tpu.dot_dimension_numbers<[1], [0], [0], [1], [0, 0, 1, 1], [], []>} : vector<8x128xbf16>, vector<128x128xbf16>, vector<8x128xf32> -> vector<8x128xf32>
    %c0_9 = arith.constant 0 : index
    %c0_10 = arith.constant 0 : index
    %10 = vector.load %arg4[%c0_9, %c0_10] : memref<8x8xf32, #tpu.memory_space<vmem>>, vector<8x8xf32>
    %cst_11 = arith.constant dense<0.000000e+00> : vector<8x128xf32>
    %11 = tpu.matmul %10, %9, %cst_11 {dimension_numbers = #tpu.dot_dimension_numbers<[1], [0], [0], [1], [0, 0, 1, 1], [], []>} : vector<8x8xf32>, vector<8x128xf32>, vector<8x128xf32> -> vector<8x128xf32>
    %c0_12 = arith.constant 0 : index
    %c0_13 = arith.constant 0 : index
    %12 = vector.load %arg5[%c0_12, %c0_13] : memref<8x1xf32, #tpu.memory_space<vmem>>, vector<8x1xf32>
    %13 = vector.broadcast %12 : vector<8x1xf32> to vector<8x128xf32>
    %14 = arith.addf %11, %13 : vector<8x128xf32>
    %15 = arith.truncf %14 : vector<8x128xf32> to vector<8x128xbf16>
    %cst_14 = arith.constant dense<0.000000e+00> : vector<8x128xf32>
    %16 = tpu.matmul %15, %0, %cst_14 {dimension_numbers = #tpu.dot_dimension_numbers<[1], [0], [0], [1], [0, 0, 1, 1], [], []>} : vector<8x128xbf16>, vector<128x128xbf16>, vector<8x128xf32> -> vector<8x128xf32>
    %c0_15 = arith.constant 0 : index
    %c0_16 = arith.constant 0 : index
    %17 = vector.load %arg6[%c0_15, %c0_16] : memref<8x1xf32, #tpu.memory_space<vmem>>, vector<8x1xf32>
    %18 = vector.broadcast %17 : vector<8x1xf32> to vector<8x128xf32>
    %19 = arith.addf %16, %18 : vector<8x128xf32>
    %c0_17 = arith.constant 0 : index
    %c0_18 = arith.constant 0 : index
    %20 = vector.load %arg7[%c0_17, %c0_18] : memref<512x8xbf16, #tpu.memory_space<vmem>>, vector<512x8xbf16>
    %21 = arith.truncf %19 : vector<8x128xf32> to vector<8x128xbf16>
    %cst_19 = arith.constant dense<0.000000e+00> : vector<512x128xf32>
    %22 = tpu.matmul %20, %21, %cst_19 {dimension_numbers = #tpu.dot_dimension_numbers<[1], [0], [0], [1], [0, 0, 1, 1], [], []>} : vector<512x8xbf16>, vector<8x128xbf16>, vector<512x128xf32> -> vector<512x128xf32>
    %c0_20 = arith.constant 0 : index
    %c0_21 = arith.constant 0 : index
    %23 = vector.load %arg8[%c0_20, %c0_21] : memref<512x1xf32, #tpu.memory_space<vmem>>, vector<512x1xf32>
    %24 = vector.broadcast %23 : vector<512x1xf32> to vector<512x128xf32>
    %25 = arith.addf %22, %24 : vector<512x128xf32>
    %cst_22 = arith.constant 0.000000e+00 : f32
    %26 = vector.broadcast %cst_22 : f32 to vector<512x128xf32>
    %27 = arith.cmpf oge, %25, %26 : vector<512x128xf32>
    %cst_23 = arith.constant 0.00999999977 : f32
    %28 = vector.broadcast %cst_23 : f32 to vector<512x128xf32>
    %29 = arith.mulf %28, %25 : vector<512x128xf32>
    %30 = arith.select %27, %25, %29 : vector<512x128xi1>, vector<512x128xf32>
    %c0_24 = arith.constant 0 : index
    %c0_25 = arith.constant 0 : index
    %31 = vector.load %arg9[%c0_24, %c0_25] : memref<128x512xbf16, #tpu.memory_space<vmem>>, vector<128x512xbf16>
    %32 = arith.truncf %30 : vector<512x128xf32> to vector<512x128xbf16>
    %cst_26 = arith.constant dense<0.000000e+00> : vector<128x128xf32>
    %33 = tpu.matmul %31, %32, %cst_26 {dimension_numbers = #tpu.dot_dimension_numbers<[1], [0], [0], [1], [0, 0, 1, 1], [], []>} : vector<128x512xbf16>, vector<512x128xbf16>, vector<128x128xf32> -> vector<128x128xf32>
    %c0_27 = arith.constant 0 : index
    %c0_28 = arith.constant 0 : index
    %34 = vector.load %arg10[%c0_27, %c0_28] : memref<128x1xf32, #tpu.memory_space<vmem>>, vector<128x1xf32>
    %35 = vector.broadcast %34 : vector<128x1xf32> to vector<128x128xf32>
    %36 = arith.addf %33, %35 : vector<128x128xf32>
    %cst_29 = arith.constant 0.000000e+00 : f32
    %37 = vector.broadcast %cst_29 : f32 to vector<128x128xf32>
    %38 = arith.cmpf oge, %36, %37 : vector<128x128xf32>
    %cst_30 = arith.constant 0.00999999977 : f32
    %39 = vector.broadcast %cst_30 : f32 to vector<128x128xf32>
    %40 = arith.mulf %39, %36 : vector<128x128xf32>
    %41 = arith.select %38, %36, %40 : vector<128x128xi1>, vector<128x128xf32>
    %c0_31 = arith.constant 0 : index
    %c0_32 = arith.constant 0 : index
    %42 = vector.load %arg11[%c0_31, %c0_32] : memref<16x128xbf16, #tpu.memory_space<vmem>>, vector<16x128xbf16>
    %43 = arith.truncf %41 : vector<128x128xf32> to vector<128x128xbf16>
    %cst_33 = arith.constant dense<0.000000e+00> : vector<16x128xf32>
    %44 = tpu.matmul %42, %43, %cst_33 {dimension_numbers = #tpu.dot_dimension_numbers<[1], [0], [0], [1], [0, 0, 1, 1], [], []>} : vector<16x128xbf16>, vector<128x128xbf16>, vector<16x128xf32> -> vector<16x128xf32>
    %c0_34 = arith.constant 0 : index
    %c0_35 = arith.constant 0 : index
    %45 = vector.load %arg12[%c0_34, %c0_35] : memref<16x1xf32, #tpu.memory_space<vmem>>, vector<16x1xf32>
    %46 = vector.broadcast %45 : vector<16x1xf32> to vector<16x128xf32>
    %47 = arith.addf %44, %46 : vector<16x128xf32>
    %cst_36 = arith.constant 0.000000e+00 : f32
    %48 = vector.broadcast %cst_36 : f32 to vector<16x128xf32>
    %49 = arith.cmpf oge, %47, %48 : vector<16x128xf32>
    %cst_37 = arith.constant 0.00999999977 : f32
    %50 = vector.broadcast %cst_37 : f32 to vector<16x128xf32>
    %51 = arith.mulf %50, %47 : vector<16x128xf32>
    %52 = arith.select %49, %47, %51 : vector<16x128xi1>, vector<16x128xf32>
    %c0_38 = arith.constant 0 : index
    %c0_39 = arith.constant 0 : index
    %53 = vector.load %arg13[%c0_38, %c0_39] : memref<16x128xf32, #tpu.memory_space<vmem>>, vector<16x128xf32>
    tpu.vector_store %arg13[%c0_38, %c0_39], %52 {strides = array<i32>} : memref<16x128xf32, #tpu.memory_space<vmem>>, vector<16x128xf32>,
    return
  }
}

</mosaic_0001>

<bundles_post_ra>
// kernel: tpu_custom_call.1
= control target key start
LH: loop header
LB: loop body
LE: loop exit
PB: predicated region body
PF: predicated region fallthrough
CT: control target
= control target key end

     0   :  { %v2355_v2 = vmov 0   ;;  %s3538_s0 = inlined_call_operand.vmem [shape: bf16[128,128], index: 0, kind: input, shape index: {}]   ;;  %s3539_s1 = inlined_call_operand.vmem [shape: bf16[8,128], index: 1, kind: input, shape index: {}]   ;;  %s3540_s2 = inlined_call_operand.vmem [shape: f32[8,8], index: 2, kind: input, shape index: {}]   ;;  %s3541_s3 = inlined_call_operand.vmem [shape: f32[8,1], index: 3, kind: input, shape index: {}]   ;;  %s3542_s4 = inlined_call_operand.vmem [shape: f32[8,8], index: 4, kind: input, shape index: {}]   ;;  %s3543_s5 = inlined_call_operand.vmem [shape: f32[8,1], index: 5, kind: input, shape index: {}]   ;;  %s3544_s6 = inlined_call_operand.vmem [shape: f32[8,1], index: 6, kind: input, shape index: {}]   ;;  %s3545_s7 = inlined_call_operand.vmem [shape: bf16[512,8], index: 7, kind: input, shape index: {}]   ;;  %s3546_s8 = inlined_call_operand.vmem [shape: f32[512,1], index: 8, kind: input, shape index: {}]   ;;  %s3547_s9 = inlined_call_operand.vmem [shape: bf16[128,512], index: 9, kind: input, shape index: {}]   ;;  %s3548_s10 = inlined_call_operand.vmem [shape: f32[128,1], index: 10, kind: input, shape index: {}]   ;;  %s3549_s11 = inlined_call_operand.vmem [shape: bf16[16,128], index: 11, kind: input, shape index: {}]   ;;  %s3550_s12 = inlined_call_operand.vmem [shape: f32[16,1], index: 12, kind: input, shape index: {}]   ;;  %s3551_s13 = inlined_call_operand.hbm [shape: f32[16,128], index: 13, kind: output, shape index: {}]  }
   0x1   :  { %v125_v0 = vld [vmem:[%s3541_s3] sm:$0xff]  ;;  %v2435_v1 = vld [vmem:[%s3538_s0 + $0x38] sm:$0xff]  ;;  %2326 = vset.pattern.permute.xlu0 %v2355_v2  ;;  %2327 = vset.pattern.permute.xlu1 %v2355_v2  ;;  %v2441_v3 = vld [vmem:[%s3538_s0 + $0x30] sm:$0xff] }
   0x2   :  { %128 = vperm.xlu0 %2326, %v125_v0   ;;  %111 = vmatpush.bf16.msra.mxu2 %v2435_v1 }
   0x3   :  { %2328 = vset.pattern.permute.xlu2 %v2355_v2 }
   0x4   :  { %18 = vsyncpa [#allocation3], 0  ;;  %v2447_v4 = vld [vmem:[%s3538_s0 + $0x28] sm:$0xff]  ;;  %v170_v5 = vld [vmem:[%s3543_s5] sm:$0xff]  ;;  %vm131_vm0 = vcmask 64512   ;;  %vm924_vm1 = vcmask 1043456  }
   0x5   :  { %v2456_v6 = vld [vmem:[%s3538_s0 + $0x20] sm:$0xff]  ;;  %v2462_v7 = vld [vmem:[%s3538_s0 + $0x18] sm:$0xff]  ;;  %v297_v8 = vld [vmem:[%s3546_s8 + $0x68] sm:$0xff]  ;;  %s2356_s19 = smov [#allocation2]   ;;  %s2357_s5 = smov 128  }
   0x6   :  { %112 = vmatpush.bf16.msra.mxu2 %v2441_v3  ;;  %v2471_v9 = vld [vmem:[%s3538_s0 + $0x10] sm:$0xff]  ;;  %v2477_v10 = vld [vmem:[%s3538_s0 + $0x8] sm:$0xff]  ;;  %v292_v11 = vld [vmem:[%s3546_s8 + $0x40] sm:$0xff]  ;;  %s1907_s20 = sshll.u32 %s2356_s19, 4  ;;  %s2358_s23 = smov 8   ;;  %s1908_s20 = int_to_ptr.vmem [resolvable:$true] %s1907_s20 }
   0x7   :  { %v2486_v12 = vld [vmem:[%s3538_s0] sm:$0xff]  ;;  %v291_v14 = vld [vmem:[%s3546_s8 + $0x38] sm:$0xff]  ;;  %v286_v15 = vld [vmem:[%s3546_s8 + $0x10] sm:$0xff] }
   0x8   :  { %v62_v13 = vld [vmem:[%s3539_s1] sm:$0xf]  ;;  %v285_v16 = vld [vmem:[%s3546_s8 + $0x8] sm:$0xff]  ;;  %v311_v18 = vld [vmem:[%s3546_s8 + $0xd8] sm:$0xff] }
   0x9   :  { %v312_v17 = vld [vmem:[%s3546_s8 + $0xe0] sm:$0xff]  ;;  %v346_v19 = vld [vmem:[%s3546_s8 + $0x1f0] sm:$0xff]  ;;  %v309_v20 = vld [vmem:[%s3546_s8 + $0xc8] sm:$0xff] }
   0xa   :  { %173 = vperm.xlu0 %2326, %v170_v5   ;;  %113 = vmatpush.bf16.msra.mxu2 %v2447_v4  ;;  %v344_v21 = vld [vmem:[%s3546_s8 + $0x1e0] sm:$0xff]  ;;  %v307_v22 = vld [vmem:[%s3546_s8 + $0xb8] sm:$0xff]  ;;  %v342_v23 = vld [vmem:[%s3546_s8 + $0x1d0] sm:$0xff] }
   0xb   :  { %v305_v24 = vld [vmem:[%s3546_s8 + $0xa8] sm:$0xff]  ;;  %v340_v25 = vld [vmem:[%s3546_s8 + $0x1c0] sm:$0xff]  ;;  %v303_v26 = vld [vmem:[%s3546_s8 + $0x98] sm:$0xff] }
   0xc   :  { %v338_v27 = vld [vmem:[%s3546_s8 + $0x1b0] sm:$0xff]  ;;  %v301_v28 = vld [vmem:[%s3546_s8 + $0x88] sm:$0xff]  ;;  %v336_v29 = vld [vmem:[%s3546_s8 + $0x1a0] sm:$0xff] }
   0xd   :  { %v319_v30 = vld [vmem:[%s3546_s8 + $0x118] sm:$0xff]  ;;  %v124_v31 = vld [vmem:[%s3540_s2] sm:$0xff]  ;;  %v333_v35 = vld [vmem:[%s3546_s8 + $0x188] sm:$0xff] }
   0xe   :  { %114 = vmatpush.bf16.msra.mxu2 %v2456_v6  ;;  %v316_v33 = vld [vmem:[%s3546_s8 + $0x100] sm:$0xff]  ;;  %v1364_v37 = vld [vmem:[%s3548_s10 + $0x58] sm:$0xff]  ;;  %v1359_v38 = vld [vmem:[%s3548_s10 + $0x30] sm:$0xff] }
   0xf   :  { %v1365_v36 = vld [vmem:[%s3548_s10 + $0x60] sm:$0xff]  ;;  %v1358_v39 = vld [vmem:[%s3548_s10 + $0x28] sm:$0xff]  ;;  %v298_v47 = vld [vmem:[%s3546_s8 + $0x70] sm:$0xff] }
  0x10   :  { %v1353_v40 = vld [vmem:[%s3548_s10] sm:$0xff]  ;;  %v1864_v41 = vld [vmem:[%s3550_s12 + $0x8] sm:$0xff]  ;;  %v294_v48 = vld [vmem:[%s3546_s8 + $0x50] sm:$0xff] }
  0x11   :  { %v200_v46 = vld [vmem:[%s3544_s6] sm:$0xff]  ;;  %v293_v49 = vld [vmem:[%s3546_s8 + $0x48] sm:$0xff]  ;;  %v287_v51 = vld [vmem:[%s3546_s8 + $0x18] sm:$0xff] }
  0x12   :  { %415 = vperm.xlu0 %2326, %v297_v8   ;;  %115 = vmatpush.bf16.msra.mxu2 %v2462_v7  ;;  %v288_v50 = vld [vmem:[%s3546_s8 + $0x20] sm:$0xff]  ;;  %v314_v52 = vld [vmem:[%s3546_s8 + $0xf0] sm:$0xff]  ;;  %v313_v53 = vld [vmem:[%s3546_s8 + $0xe8] sm:$0xff] }
  0x13   :  { %203 = vperm.xlu1 %2327, %v200_v46   ;;  %v330_v54 = vld [vmem:[%s3546_s8 + $0x170] sm:$0xff]  ;;  %v347_v55 = vld [vmem:[%s3546_s8 + $0x1f8] sm:$0xff]  ;;  %v328_v56 = vld [vmem:[%s3546_s8 + $0x160] sm:$0xff] }
  0x14   :  { %v345_v57 = vld [vmem:[%s3546_s8 + $0x1e8] sm:$0xff]  ;;  %v326_v58 = vld [vmem:[%s3546_s8 + $0x150] sm:$0xff]  ;;  %v343_v59 = vld [vmem:[%s3546_s8 + $0x1d8] sm:$0xff] }
  0x15   :  { %v169_v60 = vld [vmem:[%s3542_s4] sm:$0xff]  ;;  %v341_v0 = vld [vmem:[%s3546_s8 + $0x1c8] sm:$0xff]  ;;  %v339_v2 = vld [vmem:[%s3546_s8 + $0x1b8] sm:$0xff] }
  0x16   :  { %116 = vmatpush.bf16.msra.mxu2 %v2471_v9  ;;  %v324_v62 = vld [vmem:[%s3546_s8 + $0x140] sm:$0xff]  ;;  %v334_v5 = vld [vmem:[%s3546_s8 + $0x190] sm:$0xff]  ;;  %v1366_v8 = vld [vmem:[%s3548_s10 + $0x68] sm:$0xff] }
  0x1a   :  { %390 = vperm.xlu0 %2326, %v292_v11   ;;  %117 = vmatpush.bf16.msra.mxu2 %v2477_v10  ;;  %v1355_v11 = vld [vmem:[%s3548_s10 + $0x10] sm:$0xff] }
  0x1b   :  { %420 = vperm.xlu1 %2327, %v298_v47   ;;  %v323_v47 = vld [vmem:[%s3546_s8 + $0x138] sm:$0xff] }
  0x1e   :  { %118 = vmatpush.bf16.msra.mxu2 %v2486_v12 }
  0x21   :  { %119 = vmatmul.bf16.vlgmr.msra.gmra.mxu2 %v62_v13  ;;  %v299_v13 = vld [vmem:[%s3546_s8 + $0x78] sm:$0xff] }
  0x22   :  { %156 = vmatpush.bf16.msrb.mxu2 %v2435_v1  ;;  %385 = vperm.xlu0 %2326, %v291_v14   ;;  %v296_v14 = vld [vmem:[%s3546_s8 + $0x60] sm:$0xff] }
  0x23   :  { %400 = vperm.xlu1 %2327, %v294_v48   ;;  %425 = vperm.xlu2 %2328, %v299_v13  }
  0x26   :  { %157 = vmatpush.bf16.msrb.mxu2 %v2441_v3 }
  0x2a   :  { %158 = vmatpush.bf16.msrb.mxu2 %v2447_v4  ;;  %360 = vperm.xlu0 %2326, %v286_v15  }
  0x2b   :  { %395 = vperm.xlu1 %2327, %v293_v49   ;;  %410 = vperm.xlu2 %2328, %v296_v14   ;;  %v2256_v49 = vld [vmem:[%s3545_s7 + $0x8] sm:$0xff] }
  0x2c   :  { %v321_v14 = vld [vmem:[%s3546_s8 + $0x128] sm:$0xff] }
  0x2e   :  { %159 = vmatpush.bf16.msrb.mxu2 %v2456_v6 }
  0x32   :  { %160 = vmatpush.bf16.msrb.mxu2 %v2462_v7  ;;  %355 = vperm.xlu0 %2326, %v285_v16  }
  0x33   :  { %370 = vperm.xlu1 %2327, %v288_v50   ;;  %v2264_v50 = vld [vmem:[%s3545_s7 + $0x48] sm:$0xff] }
  0x36   :  { %161 = vmatpush.bf16.msrb.mxu2 %v2471_v9 }
  0x3a   :  { %162 = vmatpush.bf16.msrb.mxu2 %v2477_v10  ;;  %490 = vperm.xlu0 %2326, %v312_v17  }
  0x3b   :  { %365 = vperm.xlu1 %2327, %v287_v51   ;;  %v2269_v51 = vld [vmem:[%s3545_s7 + $0x70] sm:$0xff] }
  0x3e   :  { %163 = vmatpush.bf16.msrb.mxu2 %v2486_v12 }
  0x42   :  { %485 = vperm.xlu0 %2326, %v311_v18   ;;  %v295_v18 = vld [vmem:[%s3546_s8 + $0x58] sm:$0xff] }
  0x43   :  { %500 = vperm.xlu1 %2327, %v314_v52   ;;  %405 = vperm.xlu2 %2328, %v295_v18  }
  0x4a   :  { %660 = vperm.xlu0 %2326, %v346_v19  }
  0x4b   :  { %495 = vperm.xlu1 %2327, %v313_v53  }
  0x52   :  { %475 = vperm.xlu0 %2326, %v309_v20   ;;  %v290_v20 = vld [vmem:[%s3546_s8 + $0x30] sm:$0xff] }
  0x53   :  { %580 = vperm.xlu1 %2327, %v330_v54   ;;  %380 = vperm.xlu2 %2328, %v290_v20   ;;  %v300_v54 = vld [vmem:[%s3546_s8 + $0x80] sm:$0xff] }
  0x5a   :  { %650 = vperm.xlu0 %2326, %v344_v21   ;;  %v289_v21 = vld [vmem:[%s3546_s8 + $0x28] sm:$0xff] }
  0x5b   :  { %665 = vperm.xlu1 %2327, %v347_v55   ;;  %375 = vperm.xlu2 %2328, %v289_v21   ;;  %v2273_v21 = vld [vmem:[%s3545_s7 + $0x90] sm:$0xff] }
  0x62   :  { %465 = vperm.xlu0 %2326, %v307_v22   ;;  %v284_v22 = vld [vmem:[%s3546_s8] sm:$0xff] }
  0x63   :  { %570 = vperm.xlu1 %2327, %v328_v56   ;;  %350 = vperm.xlu2 %2328, %v284_v22  }
  0x6a   :  { %640 = vperm.xlu0 %2326, %v342_v23   ;;  %v315_v23 = vld [vmem:[%s3546_s8 + $0xf8] sm:$0xff] }
  0x6b   :  { %655 = vperm.xlu1 %2327, %v345_v57   ;;  %505 = vperm.xlu2 %2328, %v315_v23  }
  0x72   :  { %455 = vperm.xlu0 %2326, %v305_v24   ;;  %v310_v24 = vld [vmem:[%s3546_s8 + $0xd0] sm:$0xff] }
  0x73   :  { %560 = vperm.xlu1 %2327, %v326_v58   ;;  %480 = vperm.xlu2 %2328, %v310_v24   ;;  %v2257_v58 = vld [vmem:[%s3545_s7 + $0x10] sm:$0xff] }
  0x74   :  { %v129_v42 = vpop.permute.xlu0 %128 }
  0x7a   :  { %630 = vperm.xlu0 %2326, %v340_v25   ;;  %v331_v25 = vld [vmem:[%s3546_s8 + $0x178] sm:$0xff] }
  0x7b   :  { %645 = vperm.xlu1 %2327, %v343_v59   ;;  %585 = vperm.xlu2 %2328, %v331_v25   ;;  %v2265_v59 = vld [vmem:[%s3545_s7 + $0x50] sm:$0xff] }
  0x7c   :  { %v174_v15 = vpop.permute.xlu0 %173 }
  0x7d   :  { %v2748_v48 = vpop.permute.xlu2 %425 }
  0x82   :  { %445 = vperm.xlu0 %2326, %v303_v26   ;;  %v308_v26 = vld [vmem:[%s3546_s8 + $0xc0] sm:$0xff] }
  0x83   :  { %550 = vperm.xlu1 %2327, %v324_v62   ;;  %470 = vperm.xlu2 %2328, %v308_v26   ;;  %v2261_v26 = vld [vmem:[%s3545_s7 + $0x30] sm:$0xff] }
  0x85   :  { %v2769_v55 = vpop.permute.xlu2 %410 }
  0x8a   :  { %620 = vperm.xlu0 %2326, %v338_v27   ;;  %v329_v27 = vld [vmem:[%s3546_s8 + $0x168] sm:$0xff] }
  0x8b   :  { %635 = vperm.xlu1 %2327, %v341_v0   ;;  %575 = vperm.xlu2 %2328, %v329_v27   ;;  %v2274_v27 = vld [vmem:[%s3545_s7 + $0x98] sm:$0xff] }
  0x92   :  { %435 = vperm.xlu0 %2326, %v301_v28   ;;  %v306_v28 = vld [vmem:[%s3546_s8 + $0xb0] sm:$0xff] }
  0x93   :  { %460 = vperm.xlu2 %2328, %v306_v28  }
  0x9a   :  { %610 = vperm.xlu0 %2326, %v336_v29   ;;  %v327_v29 = vld [vmem:[%s3546_s8 + $0x158] sm:$0xff] }
  0x9b   :  { %565 = vperm.xlu2 %2328, %v327_v29  }
  0xa2   :  { %525 = vperm.xlu0 %2326, %v319_v30   ;;  %v204_v30 = vpop.permute.xlu1 %203 }
  0xa4   :  { %v120_v32 = vpop.f32.mrf.mxu2 }
  0xa5   :  { %150 = vmatpush.msra.mxu1 %v120_v32 }
  0xa6   :  { %1953 = vmatmul.msk.f32.vlgmr.msra.gmra.mxu1 %vm131_vm0, %v124_v31  ;;  %v304_v31 = vld [vmem:[%s3546_s8 + $0xa0] sm:$0xff] }
  0xa7   :  { %206 = vmatpush.bf16.msrb.mxu1 %v2435_v1  ;;  %v322_v1 = vld [vmem:[%s3546_s8 + $0x130] sm:$0xff]  ;;  %450 = vperm.xlu2 %2328, %v304_v31  }
  0xa8   :  { %540 = vperm.xlu1 %2327, %v322_v1  }
  0xaa   :  { %510 = vperm.xlu0 %2326, %v316_v33   ;;  %v2717_v32 = vpop.permute.xlu1 %420 }
  0xab   :  { %207 = vmatpush.bf16.msrb.mxu1 %v2441_v3  ;;  %v320_v3 = vld [vmem:[%s3546_s8 + $0x120] sm:$0xff] }
  0xac   :  { %v122_v34 = vpop.f32.mrf.mxu2 }
  0xad   :  { %v325_v34 = vld [vmem:[%s3546_s8 + $0x148] sm:$0xff] }
  0xaf   :  { %208 = vmatpush.bf16.msrb.mxu1 %v2447_v4  ;;  %v337_v4 = vld [vmem:[%s3546_s8 + $0x1a8] sm:$0xff]  ;;  %555 = vperm.xlu2 %2328, %v325_v34   ;;  %v2262_v34 = vld [vmem:[%s3545_s7 + $0x38] sm:$0xff] }
  0xb0   :  { %625 = vperm.xlu1 %2327, %v339_v2   ;;  %v2258_v2 = vld [vmem:[%s3545_s7 + $0x18] sm:$0xff] }
  0xb2   :  { %595 = vperm.xlu0 %2326, %v333_v35  }
  0xb3   :  { %209 = vmatpush.bf16.msrb.mxu1 %v2456_v6  ;;  %v317_v6 = vld [vmem:[%s3546_s8 + $0x108] sm:$0xff] }
  0xb7   :  { %210 = vmatpush.bf16.msrb.mxu1 %v2462_v7  ;;  %v1367_v7 = vld [vmem:[%s3548_s10 + $0x70] sm:$0xff] }
  0xb8   :  { %530 = vperm.xlu1 %2327, %v320_v3   ;;  %v2266_v3 = vld [vmem:[%s3545_s7 + $0x58] sm:$0xff] }
  0xba   :  { %1431 = vperm.xlu0 %2326, %v1365_v36   ;;  %v2722_v36 = vpop.permute.xlu0 %415 }
  0xbb   :  { %211 = vmatpush.bf16.msrb.mxu1 %v2471_v9  ;;  %v1361_v9 = vld [vmem:[%s3548_s10 + $0x40] sm:$0xff] }
  0xbf   :  { %212 = vmatpush.bf16.msrb.mxu1 %v2477_v10  ;;  %v1360_v10 = vld [vmem:[%s3548_s10 + $0x38] sm:$0xff] }
  0xc0   :  { %615 = vperm.xlu1 %2327, %v337_v4   ;;  %v2271_v4 = vld [vmem:[%s3545_s7 + $0x80] sm:$0xff] }
  0xc2   :  { %1426 = vperm.xlu0 %2326, %v1364_v37  }
  0xc3   :  { %213 = vmatpush.bf16.msrb.mxu1 %v2486_v12  ;;  %v1354_v12 = vld [vmem:[%s3548_s10 + $0x8] sm:$0xff] }
  0xc8   :  { %600 = vperm.xlu1 %2327, %v334_v5  }
  0xca   :  { %1401 = vperm.xlu0 %2326, %v1359_v38  }
  0xd0   :  { %515 = vperm.xlu1 %2327, %v317_v6  }
  0xd2   :  { %1396 = vperm.xlu0 %2326, %v1358_v39   ;;  %v2255_v39 = vld [vmem:[%s3545_s7] sm:$0xff] }
  0xd8   :  { %1441 = vperm.xlu1 %2327, %v1367_v7  }
  0xda   :  { %1371 = vperm.xlu0 %2326, %v1353_v40   ;;  %v2263_v40 = vld [vmem:[%s3545_s7 + $0x40] sm:$0xff] }
  0xe0   :  { %1436 = vperm.xlu1 %2327, %v1366_v8  }
  0xe2   :  { %1872 = vperm.xlu0 %2326, %v1864_v41   ;;  %v2730_v41 = vpop.permute.xlu1 %400 }
  0xe8   :  { %1411 = vperm.xlu1 %2327, %v1361_v9  }
  0xea   :  { %v2743_v46 = vpop.permute.xlu1 %395 }
  0xf0   :  { %1406 = vperm.xlu1 %2327, %v1360_v10   ;;  %v2259_v10 = vld [vmem:[%s3545_s7 + $0x20] sm:$0xff] }
  0xf2   :  { %v2763_v53 = vpop.permute.xlu1 %370 }
  0xf8   :  { %1381 = vperm.xlu1 %2327, %v1355_v11   ;;  %v2267_v11 = vld [vmem:[%s3545_s7 + $0x60] sm:$0xff] }
  0xfa   :  { %v2773_v57 = vpop.permute.xlu1 %365 }
 0x100   :  { %1376 = vperm.xlu1 %2327, %v1354_v12   ;;  %v2272_v12 = vld [vmem:[%s3545_s7 + $0x88] sm:$0xff] }
 0x123   :  { %v152_v43 = vpop.f32.mrf.mxu1 }
 0x124   :  { %v153_v44 = vadd.f32 %v152_v43, %v129_v42  ;;  %v2268_v42 = vld [vmem:[%s3545_s7 + $0x68] sm:$0xff] }
 0x126   :  { %v155_v45 = vpack.c.bf16 %v153_v44, %v153_v44  ;;  %v302_v44 = vld [vmem:[%s3546_s8 + $0x90] sm:$0xff] }
 0x127   :  { %440 = vperm.xlu2 %2328, %v302_v44  }
 0x128   :  { %164 = vmatmul.bf16.vlgmr.msrb.gmra.mxu2 %v155_v45  ;;  %v2741_v45 = vpop.permute.xlu0 %390 }
 0x12f   :  { %545 = vperm.xlu2 %2328, %v323_v47  }
 0x130   :  { %v2759_v52 = vpop.permute.xlu0 %385 }
 0x137   :  { %430 = vperm.xlu2 %2328, %v300_v54  }
 0x138   :  { %v2771_v56 = vpop.permute.xlu0 %360 }
 0x13f   :  { %535 = vperm.xlu2 %2328, %v321_v14  }
 0x140   :  { %v2789_v62 = vpop.permute.xlu0 %355 }
 0x141   :  { %3552 = vst [vmem:[#allocation5_spill] sm:$0xff] %v2789_v62 }
 0x148   :  { %v2795_v1 = vpop.permute.xlu0 %490 }
 0x150   :  { %v2813_v7 = vpop.permute.xlu0 %485 }
 0x158   :  { %v2828_v13 = vpop.permute.xlu0 %660 }
 0x159   :  { %3554 = vst [vmem:[#allocation7_spill] sm:$0xff] %v2828_v13 }
 0x160   :  { %v2843_v18 = vpop.permute.xlu0 %475 }
 0x168   :  { %v2857_v23 = vpop.permute.xlu0 %650 }
 0x169   :  { %3557 = vst [vmem:[#allocation10_spill] sm:$0xff] %v2857_v23 }
 0x170   :  { %v2869_v28 = vpop.permute.xlu0 %465 }
 0x178   :  { %v2877_v31 = vpop.permute.xlu0 %640 }
 0x179   :  { %3561 = vst [vmem:[#allocation14_spill] sm:$0xff] %v2877_v31 }
 0x1ab   :  { %v165_v61 = vpop.f32.mrf.mxu2 }
 0x1ac   :  { %194 = vmatpush.msra.mxu0 %v165_v61  ;;  %v2784_v61 = vpop.permute.xlu2 %405 }
 0x1ad   :  { %1954 = vmatmul.msk.f32.vlgmr.msra.gmra.mxu0 %vm131_vm0, %v169_v60  ;;  %v2270_v60 = vld [vmem:[%s3545_s7 + $0x78] sm:$0xff] }
 0x1b3   :  { %v167_v63 = vpop.f32.mrf.mxu2 }
 0x1b4   :  { %v2791_v63 = vpop.permute.xlu1 %500  ;;  %v2793_v0 = vpop.permute.xlu2 %380 }
 0x1bc   :  { %v2806_v5 = vpop.permute.xlu1 %495  ;;  %v2811_v6 = vpop.permute.xlu2 %375 }
 0x1c4   :  { %v2815_v8 = vpop.permute.xlu1 %580  ;;  %v2817_v9 = vpop.permute.xlu2 %350 }
 0x1c5   :  { %3553 = vst [vmem:[#allocation6_spill] sm:$0xff] %v2815_v8 }
 0x22a   :  { %v196_v16 = vpop.f32.mrf.mxu0 }
 0x22b   :  { %v197_v17 = vadd.f32 %v196_v16, %v174_v15  ;;  %v2836_v15 = vpop.permute.xlu1 %665  ;;  %v2838_v16 = vpop.permute.xlu2 %505 }
 0x22c   :  { %3555 = vst [vmem:[#allocation8_spill] sm:$0xff] %v2836_v15 }
 0x22d   :  { %v199_v19 = vpack.c.bf16 %v197_v17, %v197_v17  ;;  %v318_v17 = vld [vmem:[%s3546_s8 + $0x110] sm:$0xff] }
 0x22e   :  { %520 = vperm.xlu2 %2328, %v318_v17   ;;  %v2277_v17 = vld [vmem:[%s3545_s7 + $0xb0] sm:$0xff] }
 0x22f   :  { %214 = vmatmul.bf16.vlgmr.msrb.gmra.mxu1 %v199_v19  ;;  %v2260_v19 = vld [vmem:[%s3545_s7 + $0x28] sm:$0xff] }
 0x233   :  { %v2848_v20 = vpop.permute.xlu1 %570  ;;  %v2853_v22 = vpop.permute.xlu2 %480 }
 0x234   :  { %3556 = vst [vmem:[#allocation9_spill] sm:$0xff] %v2848_v20 }
 0x23b   :  { %v2859_v24 = vpop.permute.xlu1 %655  ;;  %v2861_v25 = vpop.permute.xlu2 %585 }
 0x23c   :  { %3558 = vst [vmem:[#allocation11_spill] sm:$0xff] %v2859_v24  ;;  %v1863_v24 = vld [vmem:[%s3550_s12] sm:$0xff] }
 0x23d   :  { %3559 = vst [vmem:[#allocation12_spill] sm:$0xff] %v2861_v25 }
 0x243   :  { %v2872_v29 = vpop.permute.xlu1 %560 }
 0x244   :  { %3560 = vst [vmem:[#allocation13_spill] sm:$0xff] %v2872_v29 }
 0x2ac   :  { %v215_v33 = vpop.f32.mrf.mxu1 }
 0x2ad   :  { %v216_v35 = vadd.f32 %v215_v33, %v204_v30  ;;  %v2875_v30 = vpop.permute.xlu2 %470  ;;  %v2879_v33 = vpop.permute.xlu1 %645 }
 0x2ae   :  { %3562 = vst [vmem:[#allocation15_spill] sm:$0xff] %v2879_v33 }
 0x2af   :  { %v283_v37 = vpack.c.bf16 %v216_v35, %v216_v35  ;;  %v2275_v35 = vld [vmem:[%s3545_s7 + $0xa0] sm:$0xff] }
 0x2b1   :  { %v926_v38 = vsel %vm924_vm1, %v283_v37, 0  ;;  %v335_v37 = vld [vmem:[%s3546_s8 + $0x198] sm:$0xff] }
 0x2b2   :  { %935 = vmatpush.bf16.msra.mxu1 %v926_v38  ;;  %2320 = vmatpush.bf16.msra.mxu2 %v926_v38 }
 0x2b3   :  { %2321 = vmatpush.bf16.msra.mxu3 %v926_v38  ;;  %605 = vperm.xlu2 %2328, %v335_v37   ;;  %v1357_v37 = vld [vmem:[%s3548_s10 + $0x20] sm:$0xff] }
 0x2b4   :  { %v217_v43 = vpop.f32.mrf.mxu1 }
 0x2b5   :  { %2083 = vmatmul.msk.bf16.vlgmr.msra.gmra.mxu1 %vm131_vm0, %v2255_v39  ;;  %2091 = vmatmul.msk.bf16.vlgmr.msra.gmra.mxu2 %vm131_vm0, %v2263_v40  ;;  %v2890_v38 = vpop.permute.xlu2 %575  ;;  %v2894_v39 = vpop.permute.xlu0 %455 }
 0x2b6   :  { %2096 = vmatmul.msk.bf16.vlgmr.msra.gmra.mxu3 %vm131_vm0, %v2268_v42  ;;  %3563 = vst [vmem:[#allocation16_spill] sm:$0xff] %v2890_v38  ;;  %v2896_v40 = vpop.permute.xlu1 %550  ;;  %v332_v42 = vld [vmem:[%s3546_s8 + $0x180] sm:$0xff] }
 0x2b7   :  { %3564 = vst [vmem:[#allocation17_spill] sm:$0xff] %v2896_v40 }
 0x2bb   :  { %590 = vperm.xlu2 %2328, %v332_v42  }
 0x2bd   :  { %v2901_v43 = vpop.permute.xlu2 %460  ;;  %v2903_v44 = vpop.permute.xlu0 %630 }
 0x2be   :  { %3565 = vst [vmem:[#allocation18_spill] sm:$0xff] %v2903_v44  ;;  %v2278_v44 = vld [vmem:[%s3545_s7 + $0xb8] sm:$0xff] }
 0x2c5   :  { %2084 = vmatmul.msk.bf16.gmra.mxu1 %vm131_vm0, %v2256_v49  ;;  %2092 = vmatmul.msk.bf16.gmra.mxu2 %vm131_vm0, %v2264_v50  ;;  %v2276_v49 = vld [vmem:[%s3545_s7 + $0xa8] sm:$0xff]  ;;  %v1368_v50 = vld [vmem:[%s3548_s10 + $0x78] sm:$0xff]  ;;  %v2916_v54 = vpop.permute.xlu2 %565 }
 0x2c6   :  { %2097 = vmatmul.msk.bf16.gmra.mxu3 %vm131_vm0, %v2269_v51  ;;  %1446 = vperm.xlu2 %2328, %v1368_v50   ;;  %v2913_v51 = vpop.permute.xlu1 %635  ;;  %3568 = vst [vmem:[#allocation21_spill] sm:$0xff] %v2916_v54 }
 0x2c7   :  { %3567 = vst [vmem:[#allocation20_spill] sm:$0xff] %v2913_v51  ;;  %v1356_v51 = vld [vmem:[%s3548_s10 + $0x18] sm:$0xff] }
 0x2d5   :  { %2085 = vmatmul.msk.bf16.gmra.mxu1 %vm131_vm0, %v2257_v58  ;;  %2093 = vmatmul.msk.bf16.gmra.mxu2 %vm131_vm0, %v2265_v59 }
 0x2d6   :  { %2098 = vmatmul.msk.bf16.gmra.mxu3 %vm131_vm0, %v2270_v60 }
 0x2e5   :  { %2086 = vmatmul.msk.bf16.gmra.mxu1 %vm131_vm0, %v2258_v2  ;;  %2094 = vmatmul.msk.bf16.gmra.mxu2 %vm131_vm0, %v2266_v3  ;;  %v1363_v2 = vld [vmem:[%s3548_s10 + $0x50] sm:$0xff]  ;;  %v2925_v3 = vpop.permute.xlu0 %445 }
 0x2e6   :  { %2099 = vmatmul.msk.bf16.gmra.mxu3 %vm131_vm0, %v2271_v4  ;;  %1421 = vperm.xlu2 %2328, %v1363_v2   ;;  %v2927_v4 = vpop.permute.xlu1 %540 }
 0x2f5   :  { %2087 = vmatmul.msk.bf16.gmra.mxu1 %vm131_vm0, %v2259_v10  ;;  %2095 = vmatmul.msk.bf16.gmra.mxu2 %vm131_vm0, %v2267_v11  ;;  %v2931_v11 = vpop.permute.xlu2 %450 }
 0x2f6   :  { %2100 = vmatmul.msk.bf16.gmra.mxu3 %vm131_vm0, %v2272_v12 }
 0x2fd   :  { %v2953_v42 = vpop.permute.xlu2 %555 }
 0x2fe   :  { %3572 = vst [vmem:[#allocation25_spill] sm:$0xff] %v2953_v42 }
 0x305   :  { %2088 = vmatmul.msk.bf16.gmra.mxu1 %vm131_vm0, %v2260_v19  ;;  %v1362_v19 = vld [vmem:[%s3548_s10 + $0x48] sm:$0xff]  ;;  %v2969_v31 = vpop.permute.xlu2 %440 }
 0x306   :  { %2101 = vmatmul.msk.bf16.gmra.mxu3 %vm131_vm0, %v2273_v21  ;;  %1416 = vperm.xlu2 %2328, %v1362_v19   ;;  %v2941_v21 = vpop.permute.xlu0 %620 }
 0x307   :  { %3570 = vst [vmem:[#allocation23_spill] sm:$0xff] %v2941_v21 }
 0x30e   :  { %1391 = vperm.xlu2 %2328, %v1357_v37  }
 0x315   :  { %2089 = vmatmul.msk.bf16.gmra.mxu1 %vm131_vm0, %v2261_v26  ;;  %v2944_v26 = vpop.permute.xlu1 %625 }
 0x316   :  { %2102 = vmatmul.msk.bf16.gmra.mxu3 %vm131_vm0, %v2274_v27  ;;  %3571 = vst [vmem:[#allocation24_spill] sm:$0xff] %v2944_v26  ;;  %1386 = vperm.xlu2 %2328, %v1356_v51   ;;  %v2984_v26 = vpop.permute.xlu2 %545 }
 0x31e   :  { %1867 = vperm.xlu2 %2328, %v1863_v24   ;;  %v2279_v24 = vld [vmem:[%s3545_s7 + $0xc0] sm:$0xff] }
 0x325   :  { %2090 = vmatmul.msk.bf16.gmra.mxu1 %vm131_vm0, %v2262_v34 }
 0x326   :  { %2103 = vmatmul.msk.bf16.gmra.mxu3 %vm131_vm0, %v2275_v35 }
 0x332   :  { %v2905_v47 = vpop.f32.mrf.mxu1 }
 0x333   :  { %3566 = vst [vmem:[#allocation19_spill] sm:$0xff] %v2905_v47 }
 0x336   :  { %2104 = vmatmul.msk.bf16.gmra.mxu3 %vm131_vm0, %v2276_v49  ;;  %v2955_v49 = vpop.permute.xlu0 %435 }
 0x338   :  { %v2918_v58 = vpop.f32.mrf.mxu2 }
 0x339   :  { %v1002_v59 = vpop.f32.mrf.mxu3 }
 0x33a   :  { %v2920_v60 = vpop.f32.mrf.mxu1 }
 0x33b   :  { %3569 = vst [vmem:[#allocation22_spill] sm:$0xff] %v2920_v60  ;;  %v3003_v60 = vpop.permute.xlu2 %430 }
 0x33e   :  { %v2974_v33 = vpop.permute.xlu0 %610 }
 0x33f   :  { %3573 = vst [vmem:[#allocation26_spill] sm:$0xff] %v2974_v33 }
 0x340   :  { %v2929_v10 = vpop.f32.mrf.mxu2 }
 0x341   :  { %v1004_v12 = vpop.f32.mrf.mxu3 }
 0x342   :  { %v2933_v14 = vpop.f32.mrf.mxu1 }
 0x346   :  { %2105 = vmatmul.msk.bf16.gmra.mxu3 %vm131_vm0, %v2277_v17  ;;  %v2959_v17 = vpop.permute.xlu1 %530 }
 0x348   :  { %v2946_v27 = vpop.f32.mrf.mxu2 }
 0x349   :  { %v1007_v34 = vpop.f32.mrf.mxu3 }
 0x34a   :  { %v2948_v35 = vpop.f32.mrf.mxu1  ;;  %v1008_v33 = vadd.f32 %v1007_v34, %v2795_v1  ;;  %v1003_v1 = vadd.f32 %v1002_v59, %v2853_v22 }
 0x34c   :  { %vm1125_vm5 = vcmp.ge.f32.partialorder %v1008_v33, 0.0  ;;  %vm1123_vm7 = vcmp.ge.f32.partialorder %v1003_v1, 0.0 }
 0x34e   :  { %v2981_v13 = vpop.permute.xlu1 %615 }
 0x34f   :  { %3574 = vst [vmem:[#allocation27_spill] sm:$0xff] %v2981_v13  ;;  %v2996_v13 = vpop.permute.xlu0 %525 }
 0x350   :  { %v2957_v50 = vpop.f32.mrf.mxu2 }
 0x351   :  { %v1009_v2 = vpop.f32.mrf.mxu3 }
 0x352   :  { %v2961_v19 = vpop.f32.mrf.mxu1 }
 0x356   :  { %2106 = vmatmul.msk.bf16.gmra.mxu3 %vm131_vm0, %v2278_v44  ;;  %v1010_v44 = vadd.f32 %v1009_v2, %v2806_v5  ;;  %v2999_v2 = vpop.permute.xlu1 %600 }
 0x357   :  { %3575 = vst [vmem:[#allocation28_spill] sm:$0xff] %v2999_v2 }
 0x358   :  { %v2972_v37 = vpop.f32.mrf.mxu2  ;;  %v1190_v5 = vmul.f32 0.01, %v1010_v44  ;;  %vm1126_vm4 = vcmp.ge.f32.partialorder %v1010_v44, 0.0 }
 0x359   :  { %v1012_v15 = vpop.f32.mrf.mxu3 }
 0x35a   :  { %v2976_v23 = vpop.f32.mrf.mxu1  ;;  %v1013_v51 = vadd.f32 %v1012_v15, %v2791_v63  ;;  %v1005_v63 = vadd.f32 %v1004_v12, %v2813_v7  ;;  %v1254_v8 = vsel %vm1126_vm4, %v1010_v44, %v1190_v5  ;;  %v1187_v12 = vmul.f32 0.01, %v1003_v1  ;;  %v3007_v44 = vpop.permute.xlu2 %535 }
 0x35c   :  { %v1191_v42 = vmul.f32 0.01, %v1013_v51  ;;  %vm1127_vm2 = vcmp.ge.f32.partialorder %v1013_v51, 0.0  ;;  %v1188_v20 = vmul.f32 0.01, %v1005_v63  ;;  %vm1124_vm6 = vcmp.ge.f32.partialorder %v1005_v63, 0.0 }
 0x35e   :  { %v1252_v59 = vsel %vm1124_vm6, %v1005_v63, %v1188_v20 }
 0x360   :  { %v2987_v21 = vpop.f32.mrf.mxu2 }
 0x361   :  { %v1014_v40 = vpop.f32.mrf.mxu3 }
 0x362   :  { %v1015_v29 = vadd.f32 %v1014_v40, %v2838_v16  ;;  %v2991_v54 = vpop.f32.mrf.mxu1  ;;  %v1189_v16 = vmul.f32 0.01, %v1008_v33  ;;  %v1255_v40 = vsel %vm1127_vm2, %v1013_v51, %v1191_v42  ;;  %v1251_v51 = vsel %vm1123_vm7, %v1003_v1, %v1187_v12  ;;  %v521_v12 = vpop.permute.xlu2 %520 }
 0x364   :  { %vm1128_vm3 = vcmp.ge.f32.partialorder %v1015_v29, 0.0  ;;  %v1192_v15 = vmul.f32 0.01, %v1015_v29  ;;  %v1253_v2 = vsel %vm1125_vm5, %v1008_v33, %v1189_v16 }
 0x365   :  { %v1335_v22 = vpack.c.bf16 %v1254_v8, %v1253_v2  ;;  %v2280_v8 = vld [vmem:[%s3545_s7 + $0xc8] sm:$0xff] }
 0x366   :  { %v1256_v34 = vsel %vm1128_vm3, %v1015_v29, %v1192_v15  ;;  %2107 = vmatmul.msk.bf16.gmra.mxu3 %vm131_vm0, %v2279_v24  ;;  %v511_v29 = vpop.permute.xlu0 %510  ;;  %v1334_v24 = vpack.c.bf16 %v1252_v59, %v1251_v51  ;;  %v516_v15 = vpop.permute.xlu1 %515 }
 0x367   :  { %v1336_v25 = vpack.c.bf16 %v1256_v34, %v1255_v40 }
 0x368   :  { %v992_v38 = vpop.f32.mrf.mxu2 }
 0x369   :  { %v1017_v7 = vpop.f32.mrf.mxu3  ;;  %1658 = vmatpush.bf16.msrb.mxu2 %v1336_v25  ;;  %v993_v59 = vadd.f32 %v992_v38, %v2901_v43 }
 0x36a   :  { %v3005_v62 = vpop.f32.mrf.mxu1  ;;  %v1018_v42 = vadd.f32 %v1017_v7, %v511_v29 }
 0x36b   :  { %v1183_v38 = vmul.f32 0.01, %v993_v59  ;;  %vm1119_vm13 = vcmp.ge.f32.partialorder %v993_v59, 0.0 }
 0x36c   :  { %v1193_v34 = vmul.f32 0.01, %v1018_v42  ;;  %vm1129_vm8 = vcmp.ge.f32.partialorder %v1018_v42, 0.0 }
 0x36d   :  { %1659 = vmatpush.bf16.msrb.mxu2 %v1335_v22 }
 0x36e   :  { %v3015_v33 = vsel %vm1129_vm8, %v1018_v42, %v1193_v34 }
 0x370   :  { %v994_v40 = vpop.f32.mrf.mxu2 }
 0x371   :  { %v1019_v5 = vpop.f32.mrf.mxu3  ;;  %1660 = vmatpush.bf16.msrb.mxu2 %v1334_v24  ;;  %v995_v29 = vadd.f32 %v994_v40, %v2869_v28 }
 0x372   :  { %v1020_v25 = vadd.f32 %v1019_v5, %v516_v15  ;;  %v3009_v47 = vpop.f32.mrf.mxu1  ;;  %v988_v15 = vadd.f32 %v2972_v37, %v2931_v11  ;;  %v990_v5 = vadd.f32 %v2987_v21, %v2894_v39  ;;  %v983_v39 = vadd.f32 %v2946_v27, %v2969_v31 }
 0x373   :  { %v1184_v43 = vmul.f32 0.01, %v995_v29  ;;  %vm1120_vm14 = vcmp.ge.f32.partialorder %v995_v29, 0.0  ;;  %v985_v21 = vadd.f32 %v2957_v50, %v2925_v3  ;;  %v978_v3 = vadd.f32 %v2918_v58, %v3003_v60 }
 0x374   :  { %vm1130_vm9 = vcmp.ge.f32.partialorder %v1020_v25, 0.0  ;;  %v1194_v20 = vmul.f32 0.01, %v1020_v25  ;;  %vm1117_vm1 = vcmp.ge.f32.partialorder %v988_v15, 0.0  ;;  %vm1118_vm2 = vcmp.ge.f32.partialorder %v990_v5, 0.0 }
 0x375   :  { %v980_v27 = vadd.f32 %v2929_v10, %v2955_v49  ;;  %vm1115_vm3 = vcmp.ge.f32.partialorder %v983_v39, 0.0  ;;  %vm1116_vm4 = vcmp.ge.f32.partialorder %v985_v21, 0.0  ;;  %vm1113_vm5 = vcmp.ge.f32.partialorder %v978_v3, 0.0 }
 0x376   :  { %2108 = vmatmul.msk.bf16.gmra.mxu3 %vm131_vm0, %v2280_v8  ;;  %v3017_v63 = vsel %vm1130_vm9, %v1020_v25, %v1194_v20 }
 0x377   :  { %v1337_v2 = vpack.c.bf16 %v3017_v63, %v3015_v33  ;;  %vm1114_vm6 = vcmp.ge.f32.partialorder %v980_v27, 0.0  ;;  %v2311_v33 = vld [vmem:[%s3547_s9 + $0xc4] sm:$0xf]  ;;  %v2215_v63 = vld [vmem:[%s3547_s9 + $0xd0] sm:$0xf0] }
 0x378   :  { %v997_v1 = vpop.f32.mrf.mxu2 }
 0x379   :  { %v1022_v16 = vpop.f32.mrf.mxu3  ;;  %v998_v22 = vadd.f32 %v997_v1, %v2875_v30  ;;  %v2281_v30 = vld [vmem:[%s3545_s7 + $0xd0] sm:$0xff]  ;;  %v1181_v1 = vmul.f32 0.01, %v988_v15 }
 0x37a   :  { %v3021_v7 = vpop.f32.mrf.mxu1  ;;  %v1023_v51 = vadd.f32 %v1022_v16, %v521_v12 }
 0x37b   :  { %v1185_v24 = vmul.f32 0.01, %v998_v22  ;;  %vm1121_vm10 = vcmp.ge.f32.partialorder %v998_v22, 0.0 }
 0x37c   :  { %v1195_v28 = vmul.f32 0.01, %v1023_v51  ;;  %vm1131_vm11 = vcmp.ge.f32.partialorder %v1023_v51, 0.0 }
 0x37d   :  { %v1249_v37 = vsel %vm1121_vm10, %v998_v22, %v1185_v24  ;;  %v1182_v22 = vmul.f32 0.01, %v990_v5  ;;  %v1247_v24 = vsel %vm1119_vm13, %v993_v59, %v1183_v38  ;;  %v1245_v59 = vsel %vm1117_vm1, %v988_v15, %v1181_v1 }
 0x37e   :  { %v3042_v16 = vsel %vm1131_vm11, %v1023_v51, %v1195_v28  ;;  %v1177_v28 = vmul.f32 0.01, %v978_v3 }
 0x380   :  { %v999_v42 = vpop.f32.mrf.mxu2 }
 0x381   :  { %v1000_v34 = vadd.f32 %v999_v42, %v2843_v18  ;;  %v1024_v25 = vpop.f32.mrf.mxu3  ;;  %v1248_v42 = vsel %vm1120_vm14, %v995_v29, %v1184_v43  ;;  %v1246_v29 = vsel %vm1118_vm2, %v990_v5, %v1182_v22  ;;  %v2282_v5 = vld [vmem:[%s3545_s7 + $0xd8] sm:$0xff] }
 0x382   :  { %v1025_v40 = vadd.f32 %v1024_v25, %v2996_v13  ;;  %v3035_v8 = vpop.f32.mrf.mxu1  ;;  %v1332_v51 = vpack.c.bf16 %v1248_v42, %v1247_v24  ;;  %v1331_v43 = vpack.c.bf16 %v1246_v29, %v1245_v59 }
 0x383   :  { %vm1122_vm12 = vcmp.ge.f32.partialorder %v1000_v34, 0.0  ;;  %v1186_v11 = vmul.f32 0.01, %v1000_v34 }
 0x384   :  { %vm1132_vm15 = vcmp.ge.f32.partialorder %v1025_v40, 0.0  ;;  %v1196_v18 = vmul.f32 0.01, %v1025_v40 }
 0x385   :  { %v1250_v20 = vsel %vm1122_vm12, %v1000_v34, %v1186_v11  ;;  %v1179_v34 = vmul.f32 0.01, %v983_v39 }
 0x386   :  { %2109 = vmatmul.msk.bf16.gmra.mxu3 %vm131_vm0, %v2281_v30  ;;  %v1333_v13 = vpack.c.bf16 %v1250_v20, %v1249_v37  ;;  %v3044_v12 = vsel %vm1132_vm15, %v1025_v40, %v1196_v18  ;;  %v1180_v30 = vmul.f32 0.01, %v985_v21  ;;  %v1178_v40 = vmul.f32 0.01, %v980_v27 }
 0x387   :  { %v1338_v25 = vpack.c.bf16 %v3044_v12, %v3042_v16  ;;  %v1243_v11 = vsel %vm1115_vm3, %v983_v39, %v1179_v34 }
 0x388   :  { %1661 = vmatpush.bf16.msrb.mxu2 %v1333_v13  ;;  %v1244_v58 = vsel %vm1116_vm4, %v985_v21, %v1180_v30  ;;  %v1242_v18 = vsel %vm1114_vm6, %v980_v27, %v1178_v40 }
 0x389   :  { %v1027_v31 = vpop.f32.mrf.mxu3  ;;  %v1330_v15 = vpack.c.bf16 %v1244_v58, %v1243_v11  ;;  %v2287_v58 = vld [vmem:[%s3547_s9 + $0x4] sm:$0xf] }
 0x38a   :  { %v3052_v50 = vpop.f32.mrf.mxu1  ;;  %v1028_v38 = vadd.f32 %v1027_v31, %v2959_v17  ;;  %v1241_v17 = vsel %vm1113_vm5, %v978_v3, %v1177_v28 }
 0x38b   :  { %v1329_v39 = vpack.c.bf16 %v1242_v18, %v1241_v17  ;;  %v960_v17 = vadd.f32 %v3021_v7, %v2743_v46  ;;  %v953_v46 = vadd.f32 %v2991_v54, %v2793_v0  ;;  %v955_v7 = vadd.f32 %v3005_v62, %v2759_v52  ;;  %v2291_v54 = vld [vmem:[%s3547_s9 + $0x24] sm:$0xf] }
 0x38c   :  { %1662 = vmatpush.bf16.msrb.mxu2 %v1332_v51  ;;  %v1197_v10 = vmul.f32 0.01, %v1028_v38  ;;  %vm1133_vm7 = vcmp.ge.f32.partialorder %v1028_v38, 0.0  ;;  %v2283_v51 = vld [vmem:[%s3545_s7 + $0xe0] sm:$0xff]  ;;  %v948_v52 = vadd.f32 %v2961_v19, %v2763_v53  ;;  %v943_v53 = vadd.f32 %v2933_v14, %v2771_v56 }
 0x38d   :  { %vm1106_vm2 = vcmp.ge.f32.partialorder %v960_v17, 0.0  ;;  %vm1103_vm4 = vcmp.ge.f32.partialorder %v953_v46, 0.0  ;;  %vm1104_vm5 = vcmp.ge.f32.partialorder %v955_v7, 0.0 }
 0x38e   :  { %v3060_v21 = vsel %vm1133_vm7, %v1028_v38, %v1197_v10  ;;  %v1165_v19 = vmul.f32 0.01, %v948_v52  ;;  %vm1101_vm7 = vcmp.ge.f32.partialorder %v948_v52, 0.0 }
 0x390   :  { %1663 = vmatpush.bf16.msrb.mxu2 %v1331_v43  ;;  %v1229_v56 = vsel %vm1101_vm7, %v948_v52, %v1165_v19  ;;  %v3579_v52 = vld [vmem:[#allocation6_spill] sm:$0xff]  ;;  %v3583_v19 = vld [vmem:[#allocation21_spill] sm:$0xff] }
 0x391   :  { %v1029_v60 = vpop.f32.mrf.mxu3 }
 0x392   :  { %v1030_v49 = vadd.f32 %v1029_v60, %v3007_v44  ;;  %v967_v37 = vpop.f32.mrf.mxu1 }
 0x394   :  { %vm1134_vm8 = vcmp.ge.f32.partialorder %v1030_v49, 0.0  ;;  %v1198_v20 = vmul.f32 0.01, %v1030_v49  ;;  %1664 = vmatpush.bf16.msrb.mxu2 %v1330_v15 }
 0x396   :  { %2110 = vmatmul.msk.bf16.gmra.mxu3 %vm131_vm0, %v2282_v5  ;;  %v3062_v1 = vsel %vm1134_vm8, %v1030_v49, %v1198_v20 }
 0x397   :  { %v1339_v44 = vpack.c.bf16 %v3062_v1, %v3060_v21 }
 0x398   :  { %1665 = vmatpush.bf16.msrb.mxu2 %v1329_v39 }
 0x399   :  { %v1032_v13 = vpop.f32.mrf.mxu3 }
 0x39a   :  { %v969_v22 = vpop.f32.mrf.mxu1  ;;  %v1033_v24 = vadd.f32 %v1032_v13, %v2927_v4 }
 0x39b   :  { %v970_v38 = vadd.f32 %v969_v22, %v2722_v36  ;;  %v965_v36 = vadd.f32 %v3052_v50, %v2784_v61  ;;  %v2284_v50 = vld [vmem:[%s3545_s7 + $0xe8] sm:$0xff]  ;;  %v1170_v22 = vmul.f32 0.01, %v960_v17 }
 0x39c   :  { %v1199_v31 = vmul.f32 0.01, %v1033_v24  ;;  %vm1135_vm9 = vcmp.ge.f32.partialorder %v1033_v24, 0.0 }
 0x39d   :  { %vm1110_vm14 = vcmp.ge.f32.partialorder %v970_v38, 0.0  ;;  %v1172_v18 = vmul.f32 0.01, %v965_v36  ;;  %vm1108_vm15 = vcmp.ge.f32.partialorder %v965_v36, 0.0  ;;  %v1234_v0 = vsel %vm1106_vm2, %v960_v17, %v1170_v22 }
 0x39e   :  { %v3072_v30 = vsel %vm1135_vm9, %v1033_v24, %v1199_v31  ;;  %vm1099_vm9 = vcmp.ge.f32.partialorder %v943_v53, 0.0 }
 0x39f   :  { %v1236_v24 = vsel %vm1108_vm15, %v965_v36, %v1172_v18 }
 0x3a1   :  { %v1034_v42 = vpop.f32.mrf.mxu3 }
 0x3a2   :  { %v1035_v3 = vadd.f32 %v1034_v42, %v2984_v26  ;;  %v972_v27 = vpop.f32.mrf.mxu1  ;;  %v968_v26 = vadd.f32 %v967_v37, %v2769_v55  ;;  %v1174_v55 = vmul.f32 0.01, %v970_v38 }
 0x3a3   :  { %v973_v4 = vadd.f32 %v972_v27, %v2717_v32  ;;  %v2119_v32 = vld [vmem:[%s3547_s9 + $0x10] sm:$0xf0]  ;;  %v1168_v27 = vmul.f32 0.01, %v955_v7 }
 0x3a4   :  { %vm1136_vm10 = vcmp.ge.f32.partialorder %v1035_v3, 0.0  ;;  %v1200_v34 = vmul.f32 0.01, %v1035_v3  ;;  %v1173_v60 = vmul.f32 0.01, %v968_v26  ;;  %v2122_v10 = vor.u32 %v2287_v58, %v2119_v32  ;;  %v3577_v32 = vld [vmem:[#allocation5_spill] sm:$0xff] }
 0x3a5   :  { %v1175_v40 = vmul.f32 0.01, %v973_v4  ;;  %vm1111_vm11 = vcmp.ge.f32.partialorder %v973_v4, 0.0  ;;  %vm1109_vm13 = vcmp.ge.f32.partialorder %v968_v26, 0.0  ;;  %v1238_v61 = vsel %vm1110_vm14, %v970_v38, %v1174_v55  ;;  %v2285_v55 = vld [vmem:[%s3545_s7 + $0xf0] sm:$0xff] }
 0x3a6   :  { %2111 = vmatmul.msk.bf16.gmra.mxu3 %vm131_vm0, %v2283_v51  ;;  %v3074_v59 = vsel %vm1136_vm10, %v1035_v3, %v1200_v34  ;;  %1666 = vmatmul.bf16.vlgmr.msrb.gmra.mxu2 %v2122_v10  ;;  %v1237_v39 = vsel %vm1109_vm13, %v968_v26, %v1173_v60  ;;  %v3578_v60 = vld [vmem:[#allocation22_spill] sm:$0xff] }
 0x3a7   :  { %v1340_v29 = vpack.c.bf16 %v3074_v59, %v3072_v30  ;;  %v1239_v37 = vsel %vm1111_vm11, %v973_v4, %v1175_v40  ;;  %v1327_v13 = vpack.c.bf16 %v1238_v61, %v1237_v39  ;;  %v945_v4 = vadd.f32 %v2948_v35, %v2773_v57  ;;  %v2117_v61 = vld [vmem:[%s3547_s9] sm:$0xf]  ;;  %v3587_v59 = vld [vmem:[#allocation28_spill] sm:$0xff] }
 0x3a8   :  { %v940_v10 = vadd.f32 %v3578_v60, %v3577_v32  ;;  %v3584_v32 = vld [vmem:[#allocation13_spill] sm:$0xff] }
 0x3a9   :  { %v3081_v43 = vpop.f32.mrf.mxu3  ;;  %v1164_v36 = vmul.f32 0.01, %v945_v4  ;;  %vm1100_vm8 = vcmp.ge.f32.partialorder %v945_v4, 0.0 }
 0x3aa   :  { %v974_v28 = vpop.f32.mrf.mxu1  ;;  %vm1098_vm11 = vcmp.ge.f32.partialorder %v940_v10, 0.0 }
 0x3ab   :  { %v975_v11 = vadd.f32 %v974_v28, %v2748_v48  ;;  %v963_v48 = vadd.f32 %v3035_v8, %v2730_v41  ;;  %v958_v41 = vadd.f32 %v3009_v47, %v2741_v45  ;;  %v950_v45 = vadd.f32 %v2976_v23, %v2811_v6  ;;  %v2135_v6 = vld [vmem:[%s3547_s9 + $0x30] sm:$0xf0] }
 0x3ac   :  { %v1167_v47 = vmul.f32 0.01, %v953_v46  ;;  %v2138_v34 = vor.u32 %v2291_v54, %v2135_v6  ;;  %v1232_v28 = vsel %vm1104_vm5, %v955_v7, %v1168_v27  ;;  %v3580_v54 = vld [vmem:[#allocation16_spill] sm:$0xff] }
 0x3ad   :  { %v1176_v49 = vmul.f32 0.01, %v975_v11  ;;  %vm1112_vm12 = vcmp.ge.f32.partialorder %v975_v11, 0.0  ;;  %v1171_v8 = vmul.f32 0.01, %v963_v48  ;;  %vm1107_vm1 = vcmp.ge.f32.partialorder %v963_v48, 0.0 }
 0x3ae   :  { %v1169_v42 = vmul.f32 0.01, %v958_v41  ;;  %vm1105_vm3 = vcmp.ge.f32.partialorder %v958_v41, 0.0  ;;  %v1166_v26 = vmul.f32 0.01, %v950_v45  ;;  %v1231_v38 = vsel %vm1103_vm4, %v953_v46, %v1167_v47 }
 0x3af   :  { %v1240_v15 = vsel %vm1112_vm12, %v975_v11, %v1176_v49  ;;  %v1235_v31 = vsel %vm1107_vm1, %v963_v48, %v1171_v8  ;;  %vm1102_vm6 = vcmp.ge.f32.partialorder %v950_v45, 0.0  ;;  %v1324_v40 = vpack.c.bf16 %v1232_v28, %v1231_v38  ;;  %v3576_v11 = vld [vmem:[#allocation19_spill] sm:$0xff]  ;;  %v2151_v8 = vld [vmem:[%s3547_s9 + $0x50] sm:$0xf0]  ;;  %v3582_v38 = vld [vmem:[#allocation12_spill] sm:$0xff] }
 0x3b0   :  { %v1328_v5 = vpack.c.bf16 %v1240_v15, %v1239_v37  ;;  %v1326_v3 = vpack.c.bf16 %v1236_v24, %v1235_v31  ;;  %v1233_v62 = vsel %vm1105_vm3, %v958_v41, %v1169_v42  ;;  %v938_v58 = vadd.f32 %v3576_v11, %v2817_v9  ;;  %v2295_v41 = vld [vmem:[%s3547_s9 + $0x44] sm:$0xf]  ;;  %v2286_v24 = vld [vmem:[%s3545_s7 + $0xf8] sm:$0xff]  ;;  %v2133_v31 = vld [vmem:[%s3547_s9 + $0x20] sm:$0xf] }
 0x3b1   :  { %v3096_v20 = vpop.f32.mrf.mxu3  ;;  %v1325_v23 = vpack.c.bf16 %v1234_v0, %v1233_v62  ;;  %v1230_v35 = vsel %vm1102_vm6, %v950_v45, %v1166_v26  ;;  %v1163_v49 = vmul.f32 0.01, %v943_v53  ;;  %v1162_v37 = vmul.f32 0.01, %v940_v10  ;;  %v2299_v45 = vld [vmem:[%s3547_s9 + $0x64] sm:$0xf] }
 0x3b2   :  { %1609 = vmatpush.bf16.msrb.mxu0 %v1328_v5  ;;  %v1323_v14 = vpack.c.bf16 %v1230_v35, %v1229_v56  ;;  %v1161_v48 = vmul.f32 0.01, %v938_v58  ;;  %v1228_v15 = vsel %vm1100_vm8, %v945_v4, %v1164_v36  ;;  %vm1097_vm10 = vcmp.ge.f32.partialorder %v938_v58, 0.0  ;;  %v2167_v47 = vld [vmem:[%s3547_s9 + $0x70] sm:$0xf0] }
 0x3b3   :  { %v1227_v9 = vsel %vm1099_vm9, %v943_v53, %v1163_v49  ;;  %v1226_v39 = vsel %vm1098_vm11, %v940_v10, %v1162_v37  ;;  %v2154_v46 = vor.u32 %v2295_v41, %v2151_v8  ;;  %v2170_v27 = vor.u32 %v2299_v45, %v2167_v47  ;;  %v3164_v53 = vpop.permute.xlu2 %605  ;;  %v3585_v49 = vld [vmem:[#allocation25_spill] sm:$0xff] }
 0x3b4   :  { %v1322_v5 = vpack.c.bf16 %v1228_v15, %v1227_v9  ;;  %v1225_v18 = vsel %vm1097_vm10, %v938_v58, %v1161_v48  ;;  %v1040_v56 = vadd.f32 %v3096_v20, %v3585_v49  ;;  %v2294_v49 = vld [vmem:[%s3547_s9 + $0x34] sm:$0xf0] }
 0x3b6   :  { %2112 = vmatmul.msk.bf16.gmra.mxu3 %vm131_vm0, %v2284_v50  ;;  %1610 = vmatpush.bf16.msrb.mxu0 %v1327_v13  ;;  %v2289_v50 = vld [vmem:[%s3547_s9 + $0xc] sm:$0xf0]  ;;  %v1321_v13 = vpack.c.bf16 %v1226_v39, %v1225_v18  ;;  %v2303_v18 = vld [vmem:[%s3547_s9 + $0x84] sm:$0xf]  ;;  %v1202_v39 = vmul.f32 0.01, %v1040_v56 }
 0x3b7   :  { %1671 = vmatmul.bf16.gmra.mxu2 %v2138_v34  ;;  %v2118_v7 = vor.u32 %v2289_v50, %v2117_v61  ;;  %v3581_v34 = vld [vmem:[#allocation9_spill] sm:$0xff]  ;;  %vm1138_vm2 = vcmp.ge.f32.partialorder %v1040_v56, 0.0 }
 0x3b9   :  { %v3110_v51 = vpop.f32.mrf.mxu3 }
 0x3ba   :  { %1611 = vmatpush.bf16.msrb.mxu0 %v1326_v3  ;;  %v2293_v3 = vld [vmem:[%s3547_s9 + $0x2c] sm:$0xf0]  ;;  %v1043_v60 = vadd.f32 %v3110_v51, %v3584_v32  ;;  %v2149_v51 = vld [vmem:[%s3547_s9 + $0x40] sm:$0xf] }
 0x3bb   :  { %v2134_v0 = vor.u32 %v2293_v3, %v2133_v31  ;;  %v591_v41 = vpop.permute.xlu2 %590  ;;  %v2305_v32 = vld [vmem:[%s3547_s9 + $0x8c] sm:$0xf0] }
 0x3bc   :  { %v1203_v9 = vmul.f32 0.01, %v1043_v60  ;;  %vm1139_vm1 = vcmp.ge.f32.partialorder %v1043_v60, 0.0 }
 0x3be   :  { %1612 = vmatpush.bf16.msrb.mxu0 %v1325_v23 }
 0x3c1   :  { %v1044_v57 = vpop.f32.mrf.mxu3 }
 0x3c2   :  { %1613 = vmatpush.bf16.msrb.mxu0 %v1324_v40  ;;  %v1045_v40 = vadd.f32 %v1044_v57, %v3583_v19  ;;  %v3586_v57 = vld [vmem:[#allocation17_spill] sm:$0xff]  ;;  %v2125_v19 = vld [vmem:[%s3547_s9 + $0x8] sm:$0xf] }
 0x3c3   :  { %v1038_v15 = vadd.f32 %v3081_v43, %v3586_v57  ;;  %v2183_v43 = vld [vmem:[%s3547_s9 + $0x90] sm:$0xf0] }
 0x3c4   :  { %vm1140_vm15 = vcmp.ge.f32.partialorder %v1045_v40, 0.0  ;;  %v2186_v50 = vor.u32 %v2303_v18, %v2183_v43  ;;  %v2315_v18 = vld [vmem:[%s3547_s9 + $0xe4] sm:$0xf]  ;;  %v2231_v43 = vld [vmem:[%s3547_s9 + $0xf0] sm:$0xf0] }
 0x3c5   :  { %vm1137_vm3 = vcmp.ge.f32.partialorder %v1038_v15, 0.0 }
 0x3c6   :  { %2113 = vmatmul.msk.bf16.gmra.mxu3 %vm131_vm0, %v2285_v55  ;;  %1614 = vmatpush.bf16.msrb.mxu0 %v1323_v14  ;;  %v1204_v14 = vmul.f32 0.01, %v1045_v40 }
 0x3c7   :  { %1676 = vmatmul.bf16.gmra.mxu2 %v2154_v46 }
 0x3c8   :  { %v1268_v61 = vsel %vm1140_vm15, %v1045_v40, %v1204_v14  ;;  %v2290_v40 = vld [vmem:[%s3547_s9 + $0x14] sm:$0xf0]  ;;  %v3589_v14 = vld [vmem:[#allocation27_spill] sm:$0xff] }
 0x3c9   :  { %v1047_v17 = vpop.f32.mrf.mxu3 }
 0x3ca   :  { %1615 = vmatpush.bf16.msrb.mxu0 %v1322_v5  ;;  %v1048_v4 = vadd.f32 %v1047_v17, %v3581_v34  ;;  %v2297_v17 = vld [vmem:[%s3547_s9 + $0x4c] sm:$0xf0] }
 0x3cb   :  { %v2150_v8 = vor.u32 %v2297_v17, %v2149_v51  ;;  %v2301_v34 = vld [vmem:[%s3547_s9 + $0x6c] sm:$0xf0]  ;;  %v2197_v17 = vld [vmem:[%s3547_s9 + $0xa0] sm:$0xf] }
 0x3cc   :  { %v1205_v10 = vmul.f32 0.01, %v1048_v4  ;;  %vm1141_vm14 = vcmp.ge.f32.partialorder %v1048_v4, 0.0 }
 0x3ce   :  { %1616 = vmatpush.bf16.msrb.mxu0 %v1321_v13  ;;  %v1269_v5 = vsel %vm1141_vm14, %v1048_v4, %v1205_v10  ;;  %v1201_v13 = vmul.f32 0.01, %v1038_v15  ;;  %v2307_v4 = vld [vmem:[%s3547_s9 + $0xa4] sm:$0xf]  ;;  %v3588_v10 = vld [vmem:[#allocation26_spill] sm:$0xff] }
 0x3d0   :  { %v1265_v47 = vsel %vm1137_vm3, %v1038_v15, %v1201_v13  ;;  %v2157_v13 = vld [vmem:[%s3547_s9 + $0x48] sm:$0xf] }
 0x3d1   :  { %v1049_v22 = vpop.f32.mrf.mxu3  ;;  %1617 = vmatmul.bf16.vlgmr.msrb.gmra.mxu0 %v2118_v7  ;;  %v1267_v7 = vsel %vm1139_vm1, %v1043_v60, %v1203_v9 }
 0x3d2   :  { %v1050_v6 = vadd.f32 %v1049_v22, %v3580_v54  ;;  %v1342_v22 = vpack.c.bf16 %v1268_v61, %v1267_v7 }
 0x3d4   :  { %v1206_v11 = vmul.f32 0.01, %v1050_v6  ;;  %vm1142_vm13 = vcmp.ge.f32.partialorder %v1050_v6, 0.0 }
 0x3d6   :  { %2114 = vmatmul.msk.bf16.gmra.mxu3 %vm131_vm0, %v2286_v24  ;;  %v1270_v48 = vsel %vm1142_vm13, %v1050_v6, %v1206_v11  ;;  %v1266_v24 = vsel %vm1138_vm2, %v1040_v56, %v1202_v39  ;;  %v2126_v11 = vor.u32 %v2290_v40, %v2125_v19  ;;  %v2234_v39 = vor.u32 %v2315_v18, %v2231_v43  ;;  %v2229_v40 = vld [vmem:[%s3547_s9 + $0xe0] sm:$0xf] }
 0x3d7   :  { %1681 = vmatmul.bf16.gmra.mxu2 %v2170_v27  ;;  %v1343_v20 = vpack.c.bf16 %v1270_v48, %v1269_v5  ;;  %v1341_v27 = vpack.c.bf16 %v1266_v24, %v1265_v47 }
 0x3d9   :  { %v1052_v42 = vpop.f32.mrf.mxu3 }
 0x3da   :  { %v1053_v62 = vadd.f32 %v1052_v42, %v3579_v52  ;;  %v596_v42 = vpop.permute.xlu0 %595 }
 0x3dc   :  { %v1207_v26 = vmul.f32 0.01, %v1053_v62  ;;  %vm1143_vm0 = vcmp.ge.f32.partialorder %v1053_v62, 0.0 }
 0x3de   :  { %v1271_v36 = vsel %vm1143_vm0, %v1053_v62, %v1207_v26  ;;  %v2199_v26 = vld [vmem:[%s3547_s9 + $0xb0] sm:$0xf0] }
 0x3e1   :  { %v1054_v23 = vpop.f32.mrf.mxu3  ;;  %1622 = vmatmul.bf16.gmra.mxu0 %v2134_v0 }
 0x3e2   :  { %v1055_v28 = vadd.f32 %v1054_v23, %v3582_v38  ;;  %v2165_v23 = vld [vmem:[%s3547_s9 + $0x60] sm:$0xf]  ;;  %v2202_v38 = vor.u32 %v2307_v4, %v2199_v26 }
 0x3e3   :  { %v2166_v30 = vor.u32 %v2301_v34, %v2165_v23  ;;  %v2313_v23 = vld [vmem:[%s3547_s9 + $0xcc] sm:$0xf0] }
 0x3e4   :  { %vm1144_vm12 = vcmp.ge.f32.partialorder %v1055_v28, 0.0  ;;  %v1208_v58 = vmul.f32 0.01, %v1055_v28 }
 0x3e6   :  { %v1272_v35 = vsel %vm1144_vm12, %v1055_v28, %v1208_v58 }
 0x3e7   :  { %v1344_v55 = vpack.c.bf16 %v1272_v35, %v1271_v36  ;;  %1686 = vmatmul.bf16.gmra.mxu2 %v2186_v50  ;;  %v3590_v50 = vld [vmem:[#allocation23_spill] sm:$0xff] }
 0x3e9   :  { %v1057_v37 = vpop.f32.mrf.mxu3  ;;  %1707 = vmatpush.bf16.msrb.mxu1 %v1344_v55  ;;  %v2141_v55 = vld [vmem:[%s3547_s9 + $0x28] sm:$0xf] }
 0x3ea   :  { %v1058_v46 = vadd.f32 %v1057_v37, %v591_v41  ;;  %v2142_v57 = vor.u32 %v2294_v49, %v2141_v55  ;;  %v3325_v49 = vpop.permute.xlu2 %1446 }
 0x3ec   :  { %v1209_v3 = vmul.f32 0.01, %v1058_v46  ;;  %vm1145_vm4 = vcmp.ge.f32.partialorder %v1058_v46, 0.0 }
 0x3ed   :  { %1708 = vmatpush.bf16.msrb.mxu1 %v1343_v20  ;;  %v2309_v20 = vld [vmem:[%s3547_s9 + $0xac] sm:$0xf0] }
 0x3ee   :  { %v3185_v52 = vsel %vm1145_vm4, %v1058_v46, %v1209_v3  ;;  %v2198_v61 = vor.u32 %v2309_v20, %v2197_v17  ;;  %v2298_v46 = vld [vmem:[%s3547_s9 + $0x54] sm:$0xf0]  ;;  %v3275_v3 = vpop.permute.xlu0 %1431 }
 0x3f1   :  { %v1059_v31 = vpop.f32.mrf.mxu3  ;;  %1709 = vmatpush.bf16.msrb.mxu1 %v1342_v22  ;;  %1627 = vmatmul.bf16.gmra.mxu0 %v2150_v8  ;;  %v3591_v22 = vld [vmem:[#allocation24_spill] sm:$0xff] }
 0x3f2   :  { %v1060_v45 = vadd.f32 %v1059_v31, %v596_v42  ;;  %v2158_v31 = vor.u32 %v2298_v46, %v2157_v13  ;;  %v3339_v43 = vpop.permute.xlu2 %1421  ;;  %v3593_v46 = vld [vmem:[#allocation11_spill] sm:$0xff] }
 0x3f4   :  { %vm1146_vm5 = vcmp.ge.f32.partialorder %v1060_v45, 0.0  ;;  %v1210_v0 = vmul.f32 0.01, %v1060_v45 }
 0x3f5   :  { %1710 = vmatpush.bf16.msrb.mxu1 %v1341_v27 }
 0x3f6   :  { %v3187_v62 = vsel %vm1146_vm5, %v1060_v45, %v1210_v0  ;;  %v3291_v4 = vpop.permute.xlu0 %1426 }
 0x3f7   :  { %v1345_v54 = vpack.c.bf16 %v3187_v62, %v3185_v52  ;;  %1691 = vmatmul.bf16.gmra.mxu2 %v2202_v38  ;;  %v2173_v38 = vld [vmem:[%s3547_s9 + $0x68] sm:$0xf]  ;;  %v2292_v52 = vld [vmem:[%s3547_s9 + $0x2c] sm:$0xf]  ;;  %v2143_v62 = vld [vmem:[%s3547_s9 + $0x38] sm:$0xf0] }
 0x3f9   :  { %v1062_v6 = vpop.f32.mrf.mxu3  ;;  %1711 = vmatpush.bf16.msrb.mxu1 %v1340_v29 }
 0x3fa   :  { %v1063_v29 = vadd.f32 %v1062_v6, %v3587_v59  ;;  %v2213_v6 = vld [vmem:[%s3547_s9 + $0xc0] sm:$0xf] }
 0x3fb   :  { %v2214_v34 = vor.u32 %v2313_v23, %v2213_v6  ;;  %v3594_v6 = vld [vmem:[#allocation10_spill] sm:$0xff] }
 0x3fc   :  { %v1211_v21 = vmul.f32 0.01, %v1063_v29  ;;  %vm1147_vm6 = vcmp.ge.f32.partialorder %v1063_v29, 0.0 }
 0x3fd   :  { %1712 = vmatpush.bf16.msrb.mxu1 %v1339_v44 }
 0x3fe   :  { %v3223_v16 = vsel %vm1147_vm6, %v1063_v29, %v1211_v21  ;;  %v3301_v29 = vpop.permute.xlu1 %1441  ;;  %v3303_v19 = vpop.permute.xlu0 %1401  ;;  %v2317_v21 = vld [vmem:[%s3547_s9 + $0xec] sm:$0xf0] }
 0x401   :  { %v1064_v28 = vpop.f32.mrf.mxu3  ;;  %1713 = vmatpush.bf16.msrb.mxu1 %v1338_v25  ;;  %1632 = vmatmul.bf16.gmra.mxu0 %v2166_v30  ;;  %v2302_v30 = vld [vmem:[%s3547_s9 + $0x74] sm:$0xf0] }
 0x402   :  { %v1065_v1 = vadd.f32 %v1064_v28, %v3164_v53  ;;  %v2181_v53 = vld [vmem:[%s3547_s9 + $0x80] sm:$0xf]  ;;  %v2174_v59 = vor.u32 %v2302_v30, %v2173_v38  ;;  %v3595_v38 = vld [vmem:[#allocation8_spill] sm:$0xff] }
 0x403   :  { %v2182_v60 = vor.u32 %v2305_v32, %v2181_v53  ;;  %v2189_v53 = vld [vmem:[%s3547_s9 + $0x88] sm:$0xf]  ;;  %v2306_v32 = vld [vmem:[%s3547_s9 + $0x94] sm:$0xf0] }
 0x404   :  { %vm1148_vm7 = vcmp.ge.f32.partialorder %v1065_v1, 0.0  ;;  %v1212_v44 = vmul.f32 0.01, %v1065_v1 }
 0x405   :  { %1714 = vmatpush.bf16.msrb.mxu1 %v1337_v2  ;;  %v2218_v2 = vor.u32 %v2311_v33, %v2215_v63  ;;  %v2190_v63 = vor.u32 %v2306_v32, %v2189_v53  ;;  %v3597_v32 = vld [vmem:[#allocation14_spill] sm:$0xff] }
 0x406   :  { %v3225_v12 = vsel %vm1148_vm7, %v1065_v1, %v1212_v44  ;;  %v2230_v1 = vor.u32 %v2317_v21, %v2229_v40  ;;  %v3319_v33 = vpop.permute.xlu0 %1396  ;;  %v3356_v21 = vpop.permute.xlu2 %1416 }
 0x407   :  { %v1346_v25 = vpack.c.bf16 %v3225_v12, %v3223_v16  ;;  %1696 = vmatmul.bf16.gmra.mxu2 %v2218_v2 }
 0x408   :  { %1715 = vmatmul.bf16.vlgmr.msrb.gmra.mxu1 %v2126_v11  ;;  %v3311_v11 = vpop.permute.xlu1 %1436 }
 0x409   :  { %v1067_v58 = vpop.f32.mrf.mxu3 }
 0x40a   :  { %v1068_v36 = vadd.f32 %v1067_v58, %v3588_v10 }
 0x40c   :  { %v1213_v56 = vmul.f32 0.01, %v1068_v36  ;;  %vm1149_vm8 = vcmp.ge.f32.partialorder %v1068_v36, 0.0 }
 0x40e   :  { %v3249_v15 = vsel %vm1149_vm8, %v1068_v36, %v1213_v56  ;;  %v1372_v36 = vpop.permute.xlu0 %1371 }
 0x410   :  { %v3323_v10 = vpop.permute.xlu1 %1411 }
 0x411   :  { %v1069_v35 = vpop.f32.mrf.mxu3  ;;  %1637 = vmatmul.bf16.gmra.mxu0 %v2182_v60 }
 0x412   :  { %v1070_v48 = vadd.f32 %v1069_v35, %v3589_v14 }
 0x414   :  { %vm1150_vm9 = vcmp.ge.f32.partialorder %v1070_v48, 0.0  ;;  %v1214_v37 = vmul.f32 0.01, %v1070_v48 }
 0x416   :  { %v3251_v9 = vsel %vm1150_vm9, %v1070_v48, %v1214_v37  ;;  %v2205_v48 = vld [vmem:[%s3547_s9 + $0xa8] sm:$0xf]  ;;  %v2310_v37 = vld [vmem:[%s3547_s9 + $0xb4] sm:$0xf0] }
 0x417   :  { %v1347_v5 = vpack.c.bf16 %v3251_v9, %v3249_v15  ;;  %1701 = vmatmul.bf16.gmra.mxu2 %v2234_v39  ;;  %v2206_v17 = vor.u32 %v2310_v37, %v2205_v48  ;;  %v3598_v37 = vld [vmem:[#allocation20_spill] sm:$0xff] }
 0x418   :  { %1720 = vmatmul.bf16.gmra.mxu1 %v2142_v57 }
 0x419   :  { %v1072_v51 = vpop.f32.mrf.mxu3 }
 0x41a   :  { %v1073_v41 = vadd.f32 %v1072_v51, %v3590_v50  ;;  %v3335_v51 = vpop.permute.xlu1 %1406  ;;  %v3592_v50 = vld [vmem:[#allocation7_spill] sm:$0xff] }
 0x41c   :  { %v1215_v7 = vmul.f32 0.01, %v1073_v41  ;;  %vm1151_vm10 = vcmp.ge.f32.partialorder %v1073_v41, 0.0 }
 0x41e   :  { %v3277_v45 = vsel %vm1151_vm10, %v1073_v41, %v1215_v7 }
 0x421   :  { %v1074_v8 = vpop.f32.mrf.mxu3  ;;  %1642 = vmatmul.bf16.gmra.mxu0 %v2198_v61 }
 0x422   :  { %v1075_v24 = vadd.f32 %v1074_v8, %v3591_v22  ;;  %v1382_v61 = vpop.permute.xlu1 %1381 }
 0x424   :  { %vm1152_vm11 = vcmp.ge.f32.partialorder %v1075_v24, 0.0  ;;  %v1216_v42 = vmul.f32 0.01, %v1075_v24 }
 0x426   :  { %v3279_v47 = vsel %vm1152_vm11, %v1075_v24, %v1216_v42  ;;  %v2221_v42 = vld [vmem:[%s3547_s9 + $0xc8] sm:$0xf] }
 0x427   :  { %v1348_v27 = vpack.c.bf16 %v3279_v47, %v3277_v45  ;;  %v2127_v45 = vld [vmem:[%s3547_s9 + $0x18] sm:$0xf0] }
 0x428   :  { %1725 = vmatmul.bf16.gmra.mxu1 %v2158_v31  ;;  %v2314_v31 = vld [vmem:[%s3547_s9 + $0xd4] sm:$0xf0] }
 0x429   :  { %v3283_v0 = vpop.f32.mrf.mxu3  ;;  %v1667_v44 = vpop.f32.mrf.mxu2  ;;  %v2222_v53 = vor.u32 %v2314_v31, %v2221_v42 }
 0x42a   :  { %v1377_v12 = vpop.permute.xlu1 %1376 }
 0x431   :  { %v3293_v26 = vpop.f32.mrf.mxu3  ;;  %1647 = vmatmul.bf16.gmra.mxu0 %v2214_v34  ;;  %v3321_v2 = vpop.f32.mrf.mxu2 }
 0x438   :  { %1730 = vmatmul.bf16.gmra.mxu1 %v2174_v59  ;;  %v3596_v59 = vld [vmem:[#allocation15_spill] sm:$0xff] }
 0x439   :  { %v1082_v28 = vpop.f32.mrf.mxu3 }
 0x43a   :  { %v1672_v57 = vpop.f32.mrf.mxu2 }
 0x441   :  { %v1084_v58 = vpop.f32.mrf.mxu3  ;;  %1652 = vmatmul.bf16.gmra.mxu0 %v2230_v1 }
 0x442   :  { %v3341_v39 = vpop.f32.mrf.mxu2  ;;  %v1085_v40 = vadd.f32 %v1084_v58, %v3596_v59  ;;  %v1080_v58 = vadd.f32 %v3293_v26, %v3598_v37 }
 0x444   :  { %vm1156_vm15 = vcmp.ge.f32.partialorder %v1085_v40, 0.0  ;;  %vm1154_vm2 = vcmp.ge.f32.partialorder %v1080_v58, 0.0 }
 0x448   :  { %1735 = vmatmul.bf16.gmra.mxu1 %v2190_v63  ;;  %v1083_v63 = vadd.f32 %v1082_v28, %v3597_v32 }
 0x449   :  { %v1087_v60 = vpop.f32.mrf.mxu3 }
 0x44a   :  { %v1088_v23 = vadd.f32 %v1087_v60, %v3594_v6  ;;  %v1677_v60 = vpop.f32.mrf.mxu2  ;;  %v1219_v28 = vmul.f32 0.01, %v1083_v63  ;;  %vm1155_vm1 = vcmp.ge.f32.partialorder %v1083_v63, 0.0 }
 0x44c   :  { %vm1157_vm14 = vcmp.ge.f32.partialorder %v1088_v23, 0.0  ;;  %v1283_v26 = vsel %vm1155_vm1, %v1083_v63, %v1219_v28 }
 0x44e   :  { %v1618_v35 = vpop.f32.mrf.mxu0 }
 0x44f   :  { %v1619_v55 = vadd.f32 %v1618_v35, %v1372_v36  ;;  %v1221_v36 = vmul.f32 0.01, %v1088_v23 }
 0x451   :  { %v1089_v56 = vpop.f32.mrf.mxu3  ;;  %v3327_v14 = vadd.f32 %v1667_v44, %v1619_v55 }
 0x452   :  { %v1090_v7 = vadd.f32 %v1089_v56, %v3593_v46  ;;  %v1392_v46 = vpop.permute.xlu2 %1391 }
 0x454   :  { %v1222_v1 = vmul.f32 0.01, %v1090_v7  ;;  %vm1158_vm13 = vcmp.ge.f32.partialorder %v1090_v7, 0.0 }
 0x456   :  { %v3337_v20 = vpop.f32.mrf.mxu0 }
 0x458   :  { %1740 = vmatmul.bf16.gmra.mxu1 %v2206_v17  ;;  %v1286_v17 = vsel %vm1158_vm13, %v1090_v7, %v1222_v1 }
 0x459   :  { %v1092_v18 = vpop.f32.mrf.mxu3 }
 0x45a   :  { %v1093_v41 = vadd.f32 %v1092_v18, %v3592_v50  ;;  %v3599_v18 = vld [vmem:[#allocation18_spill] sm:$0xff]  ;;  %v1285_v50 = vsel %vm1157_vm14, %v1088_v23, %v1221_v36  ;;  %v2288_v36 = vld [vmem:[%s3547_s9 + $0xc] sm:$0xf] }
 0x45b   :  { %v2318_v23 = vld [vmem:[%s3547_s9 + $0xf4] sm:$0xf0]  ;;  %v2130_v47 = vor.u32 %v2288_v36, %v2127_v45  ;;  %v2223_v36 = vld [vmem:[%s3547_s9 + $0xd8] sm:$0xf0] }
 0x45c   :  { %v1223_v34 = vmul.f32 0.01, %v1093_v41  ;;  %vm1159_vm0 = vcmp.ge.f32.partialorder %v1093_v41, 0.0 }
 0x45e   :  { %v1623_v8 = vpop.f32.mrf.mxu0  ;;  %v1287_v35 = vsel %vm1159_vm0, %v1093_v41, %v1223_v34  ;;  %v1351_v41 = vpack.c.bf16 %v1286_v17, %v1285_v50  ;;  %v1679_v34 = vpop.f32.mrf.mxu2 }
 0x45f   :  { %v1624_v13 = vadd.f32 %v1623_v8, %v1382_v61  ;;  %v1078_v61 = vadd.f32 %v3283_v0, %v3599_v18  ;;  %v1218_v8 = vmul.f32 0.01, %v1080_v58  ;;  %v2237_v0 = vld [vmem:[%s3547_s9 + $0xe8] sm:$0xf]  ;;  %v2296_v18 = vld [vmem:[%s3547_s9 + $0x4c] sm:$0xf] }
 0x461   :  { %v1094_v22 = vpop.f32.mrf.mxu3  ;;  %v3345_v24 = vadd.f32 %v1672_v57, %v1624_v13  ;;  %v1220_v57 = vmul.f32 0.01, %v1085_v40  ;;  %vm1153_vm3 = vcmp.ge.f32.partialorder %v1078_v61, 0.0  ;;  %v1282_v6 = vsel %vm1154_vm2, %v1080_v58, %v1218_v8 }
 0x462   :  { %v1095_v30 = vadd.f32 %v1094_v22, %v3595_v38  ;;  %v1217_v22 = vmul.f32 0.01, %v1078_v61 }
 0x463   :  { %v1284_v13 = vsel %vm1156_vm15, %v1085_v40, %v1220_v57  ;;  %v2238_v40 = vor.u32 %v2318_v23, %v2237_v0  ;;  %v2191_v0 = vld [vmem:[%s3547_s9 + $0x98] sm:$0xf0] }
 0x464   :  { %vm1160_vm12 = vcmp.ge.f32.partialorder %v1095_v30, 0.0  ;;  %v1224_v44 = vmul.f32 0.01, %v1095_v30  ;;  %v1350_v7 = vpack.c.bf16 %v1284_v13, %v1283_v26  ;;  %v2300_v13 = vld [vmem:[%s3547_s9 + $0x6c] sm:$0xf] }
 0x466   :  { %v1288_v55 = vsel %vm1160_vm12, %v1095_v30, %v1224_v44  ;;  %v3359_v56 = vpop.f32.mrf.mxu0  ;;  %v1281_v30 = vsel %vm1153_vm3, %v1078_v61, %v1217_v22  ;;  %v1682_v44 = vpop.f32.mrf.mxu2  ;;  %v2159_v61 = vld [vmem:[%s3547_s9 + $0x58] sm:$0xf0] }
 0x467   :  { %v1352_v48 = vpack.c.bf16 %v1288_v55, %v1287_v35  ;;  %v1349_v59 = vpack.c.bf16 %v1282_v6, %v1281_v30  ;;  %v2162_v28 = vor.u32 %v2296_v18, %v2159_v61 }
 0x468   :  { %1745 = vmatmul.bf16.gmra.mxu1 %v2222_v53 }
 0x469   :  { %1756 = vmatpush.bf16.msra.mxu0 %v1352_v48 }
 0x46d   :  { %1757 = vmatpush.bf16.msra.mxu0 %v1351_v41 }
 0x46e   :  { %v1628_v42 = vpop.f32.mrf.mxu0 }
 0x46f   :  { %v1629_v31 = vadd.f32 %v1628_v42, %v1392_v46  ;;  %v2175_v46 = vld [vmem:[%s3547_s9 + $0x78] sm:$0xf0] }
 0x470   :  { %v2178_v22 = vor.u32 %v2300_v13, %v2175_v46 }
 0x471   :  { %v1678_v38 = vadd.f32 %v1677_v60, %v1629_v31  ;;  %1758 = vmatpush.bf16.msra.mxu0 %v1350_v7 }
 0x475   :  { %1759 = vmatpush.bf16.msra.mxu0 %v1349_v59 }
 0x476   :  { %v1630_v1 = vpop.f32.mrf.mxu0 }
 0x477   :  { %v1631_v41 = vadd.f32 %v1630_v1, %v3319_v33  ;;  %v2207_v1 = vld [vmem:[%s3547_s9 + $0xb8] sm:$0xf0] }
 0x478   :  { %1750 = vmatmul.bf16.gmra.mxu1 %v2238_v40  ;;  %v2308_v40 = vld [vmem:[%s3547_s9 + $0xac] sm:$0xf] }
 0x479   :  { %1760 = vmatpush.bf16.msra.mxu0 %v1348_v27  ;;  %v1684_v27 = vpop.f32.mrf.mxu2 }
 0x47d   :  { %1761 = vmatpush.bf16.msra.mxu0 %v1347_v5 }
 0x47e   :  { %v1633_v53 = vpop.f32.mrf.mxu0 }
 0x47f   :  { %v1634_v32 = vadd.f32 %v1633_v53, %v3303_v19 }
 0x481   :  { %v1683_v63 = vadd.f32 %v1682_v44, %v1634_v32  ;;  %1762 = vmatpush.bf16.msra.mxu0 %v1346_v25  ;;  %v1621_v25 = vadd.f32 %v3337_v20, %v1377_v12  ;;  %v1687_v60 = vpop.f32.mrf.mxu2  ;;  %v1387_v20 = vpop.permute.xlu2 %1386  ;;  %v2210_v44 = vor.u32 %v2308_v40, %v2207_v1 }
 0x482   :  { %v1626_v58 = vadd.f32 %v3359_v56, %v1387_v20  ;;  %v1680_v56 = vadd.f32 %v1679_v34, %v1631_v41 }
 0x483   :  { %v1670_v5 = vadd.f32 %v3321_v2, %v1621_v25 }
 0x485   :  { %v1716_v15 = vpop.f32.mrf.mxu1  ;;  %1763 = vmatpush.bf16.msra.mxu0 %v1345_v54  ;;  %v2146_v54 = vor.u32 %v2292_v52, %v2143_v62 }
 0x486   :  { %v3391_v9 = vadd.f32 %v1716_v15, %v3327_v14  ;;  %v1635_v16 = vpop.f32.mrf.mxu0  ;;  %v2239_v15 = vld [vmem:[%s3547_s9 + $0xf8] sm:$0xf0] }
 0x487   :  { %v1636_v31 = vadd.f32 %v1635_v16, %v3335_v51 }
 0x488   :  { %1764 = vmatmul.bf16.vlgmr.msra.gmra.mxu0 %v2130_v47 }
 0x489   :  { %v1685_v33 = vadd.f32 %v1684_v27, %v1636_v31  ;;  %v2316_v27 = vld [vmem:[%s3547_s9 + $0xec] sm:$0xf]  ;;  %v1689_v31 = vpop.f32.mrf.mxu2 }
 0x48a   :  { %v2242_v12 = vor.u32 %v2316_v27, %v2239_v15 }
 0x48d   :  { %v1718_v19 = vpop.f32.mrf.mxu1 }
 0x48e   :  { %v3395_v35 = vadd.f32 %v1718_v19, %v1670_v5  ;;  %v1638_v55 = vpop.f32.mrf.mxu0 }
 0x48f   :  { %v1639_v48 = vadd.f32 %v1638_v55, %v3323_v10  ;;  %v1675_v10 = vadd.f32 %v3341_v39, %v1626_v58 }
 0x491   :  { %v1688_v37 = vadd.f32 %v1687_v60, %v1639_v48  ;;  %v1692_v40 = vpop.f32.mrf.mxu2 }
 0x495   :  { %v1721_v14 = vpop.f32.mrf.mxu1 }
 0x496   :  { %v3405_v2 = vadd.f32 %v1721_v14, %v3345_v24  ;;  %v3429_v34 = vpop.f32.mrf.mxu0 }
 0x498   :  { %1769 = vmatmul.bf16.gmra.mxu0 %v2146_v54 }
 0x49d   :  { %v1723_v57 = vpop.f32.mrf.mxu1 }
 0x49e   :  { %v1724_v17 = vadd.f32 %v1723_v57, %v1675_v10  ;;  %v3439_v51 = vpop.f32.mrf.mxu0 }
 0x4a5   :  { %v1726_v50 = vpop.f32.mrf.mxu1 }
 0x4a6   :  { %v3415_v24 = vadd.f32 %v1726_v50, %v1678_v38  ;;  %v2304_v38 = vld [vmem:[%s3547_s9 + $0x8c] sm:$0xf]  ;;  %v3447_v53 = vpop.f32.mrf.mxu0 }
 0x4a7   :  { %v2194_v23 = vor.u32 %v2304_v38, %v2191_v0 }
 0x4a8   :  { %1774 = vmatmul.bf16.gmra.mxu0 %v2162_v28 }
 0x4ad   :  { %v1728_v8 = vpop.f32.mrf.mxu1 }
 0x4ae   :  { %v1729_v39 = vadd.f32 %v1728_v8, %v1680_v56  ;;  %v3449_v32 = vpop.f32.mrf.mxu0 }
 0x4b5   :  { %v1731_v42 = vpop.f32.mrf.mxu1 }
 0x4b6   :  { %v3424_v26 = vadd.f32 %v1731_v42, %v1683_v63  ;;  %v2312_v63 = vld [vmem:[%s3547_s9 + $0xcc] sm:$0xf]  ;;  %v3457_v47 = vpop.f32.mrf.mxu0 }
 0x4b7   :  { %v2226_v45 = vor.u32 %v2312_v63, %v2223_v36 }
 0x4b8   :  { %1779 = vmatmul.bf16.gmra.mxu0 %v2178_v22 }
 0x4bd   :  { %v1733_v7 = vpop.f32.mrf.mxu1 }
 0x4be   :  { %v3427_v6 = vadd.f32 %v1733_v7, %v1685_v33  ;;  %v3465_v16 = vpop.f32.mrf.mxu0 }
 0x4c5   :  { %v1736_v30 = vpop.f32.mrf.mxu1 }
 0x4c6   :  { %v3437_v59 = vadd.f32 %v1736_v30, %v1688_v37  ;;  %v3467_v25 = vpop.f32.mrf.mxu0 }
 0x4c8   :  { %1784 = vmatmul.bf16.gmra.mxu0 %v2194_v23 }
 0x4cd   :  { %v1738_v33 = vpop.f32.mrf.mxu1 }
 0x4d5   :  { %v1741_v63 = vpop.f32.mrf.mxu1 }
 0x4d8   :  { %1789 = vmatmul.bf16.gmra.mxu0 %v2210_v44 }
 0x4e8   :  { %1794 = vmatmul.bf16.gmra.mxu0 %v2226_v45 }
 0x4f8   :  { %1799 = vmatmul.bf16.gmra.mxu0 %v2242_v12  ;;  %v1694_v12 = vpop.f32.mrf.mxu2 }
 0x505   :  { %v1765_v5 = vpop.f32.mrf.mxu0 }
 0x506   :  { %v1766_v19 = vadd.f32 %v1765_v5, %v3391_v9 }
 0x508   :  { %v1821_v60 = vmul.f32 0.01, %v1766_v19  ;;  %vm1805_vm4 = vcmp.ge.f32.partialorder %v1766_v19, 0.0 }
 0x50a   :  { %v3471_v52 = vsel %vm1805_vm4, %v1766_v19, %v1821_v60  ;;  %v1743_v19 = vpop.f32.mrf.mxu1 }
 0x50d   :  { %v1767_v55 = vpop.f32.mrf.mxu0 }
 0x50e   :  { %v1768_v48 = vadd.f32 %v1767_v55, %v3395_v35  ;;  %v1644_v55 = vadd.f32 %v3439_v51, %v3339_v43 }
 0x510   :  { %vm1806_vm5 = vcmp.ge.f32.partialorder %v1768_v48, 0.0  ;;  %v1822_v37 = vmul.f32 0.01, %v1768_v48 }
 0x512   :  { %v3473_v62 = vsel %vm1806_vm5, %v1768_v48, %v1822_v37  ;;  %v1646_v37 = vadd.f32 %v3447_v53, %v3291_v4 }
 0x513   :  { %v1855_v54 = vpack.c.bf16 %v3473_v62, %v3471_v52 }
 0x515   :  { %v1770_v14 = vpop.f32.mrf.mxu0 }
 0x516   :  { %v1771_v20 = vadd.f32 %v1770_v14, %v3405_v2 }
 0x518   :  { %v1823_v10 = vmul.f32 0.01, %v1771_v20  ;;  %vm1807_vm6 = vcmp.ge.f32.partialorder %v1771_v20, 0.0 }
 0x51a   :  { %v3478_v35 = vsel %vm1807_vm6, %v1771_v20, %v1823_v10  ;;  %v1697_v20 = vpop.f32.mrf.mxu2 }
 0x51d   :  { %v1772_v58 = vpop.f32.mrf.mxu0 }
 0x51e   :  { %v1773_v9 = vadd.f32 %v1772_v58, %v1724_v17  ;;  %v1695_v58 = vadd.f32 %v1694_v12, %v1646_v37 }
 0x520   :  { %vm1808_vm7 = vcmp.ge.f32.partialorder %v1773_v9, 0.0  ;;  %v1824_v57 = vmul.f32 0.01, %v1773_v9 }
 0x522   :  { %v3480_v18 = vsel %vm1808_vm7, %v1773_v9, %v1824_v57  ;;  %v1746_v9 = vpop.f32.mrf.mxu1  ;;  %v1744_v57 = vadd.f32 %v1743_v19, %v1695_v58 }
 0x523   :  { %v1856_v61 = vpack.c.bf16 %v3480_v18, %v3478_v35 }
 0x525   :  { %v1775_v28 = vpop.f32.mrf.mxu0 }
 0x526   :  { %v1776_v50 = vadd.f32 %v1775_v28, %v3415_v24 }
 0x528   :  { %v1825_v56 = vmul.f32 0.01, %v1776_v50  ;;  %vm1809_vm8 = vcmp.ge.f32.partialorder %v1776_v50, 0.0 }
 0x52a   :  { %v3485_v17 = vsel %vm1809_vm8, %v1776_v50, %v1825_v56  ;;  %v1748_v4 = vpop.f32.mrf.mxu1 }
 0x52d   :  { %v1777_v41 = vpop.f32.mrf.mxu0 }
 0x52e   :  { %v1778_v8 = vadd.f32 %v1777_v41, %v1729_v39  ;;  %v1649_v41 = vadd.f32 %v3449_v32, %v3275_v3  ;;  %v1654_v32 = vadd.f32 %v3465_v16, %v3301_v29 }
 0x530   :  { %vm1810_vm9 = vcmp.ge.f32.partialorder %v1778_v8, 0.0  ;;  %v1826_v2 = vmul.f32 0.01, %v1778_v8 }
 0x532   :  { %v3487_v13 = vsel %vm1810_vm9, %v1778_v8, %v1826_v2  ;;  %v1699_v2 = vpop.f32.mrf.mxu2 }
 0x533   :  { %v1857_v46 = vpack.c.bf16 %v3487_v13, %v3485_v17  ;;  %v1873_v13 = vpop.permute.xlu0 %1872 }
 0x535   :  { %v1780_v22 = vpop.f32.mrf.mxu0 }
 0x536   :  { %v1781_v42 = vadd.f32 %v1780_v22, %v3424_v26  ;;  %v1641_v26 = vadd.f32 %v3429_v34, %v3356_v21 }
 0x538   :  { %v1827_v24 = vmul.f32 0.01, %v1781_v42  ;;  %vm1811_vm10 = vcmp.ge.f32.partialorder %v1781_v42, 0.0  ;;  %v1690_v36 = vadd.f32 %v1689_v31, %v1641_v26  ;;  %v1651_v31 = vadd.f32 %v3457_v47, %v3311_v11 }
 0x539   :  { %v1656_v47 = vadd.f32 %v3467_v25, %v3325_v49  ;;  %v2319_v49 = vld [vmem:[%s3549_s11] sm:$0xff]  ;;  %v1868_v25 = vpop.permute.xlu2 %1867  ;;  %s1909_s11 = sshll.u32 %s3551_s13, 4  ;;  %s1910_s11 = int_to_ptr.hbm [resolvable:$true] %s1909_s11 }
 0x53a   :  { %v3493_v0 = vsel %vm1811_vm10, %v1781_v42, %v1827_v24  ;;  %v1698_v42 = vadd.f32 %v1697_v20, %v1649_v41 }
 0x53d   :  { %v1782_v7 = vpop.f32.mrf.mxu0 }
 0x53e   :  { %v1783_v38 = vadd.f32 %v1782_v7, %v3427_v6  ;;  %v1739_v6 = vadd.f32 %v1738_v33, %v1690_v36  ;;  %v1747_v33 = vadd.f32 %v1746_v9, %v1698_v42  ;;  %v1700_v7 = vadd.f32 %v1699_v2, %v1651_v31 }
 0x540   :  { %vm1812_vm11 = vcmp.ge.f32.partialorder %v1783_v38, 0.0  ;;  %v1828_v39 = vmul.f32 0.01, %v1783_v38 }
 0x542   :  { %v3495_v23 = vsel %vm1812_vm11, %v1783_v38, %v1828_v39  ;;  %v1749_v38 = vadd.f32 %v1748_v4, %v1700_v7  ;;  %v1702_v39 = vpop.f32.mrf.mxu2 }
 0x543   :  { %v1858_v30 = vpack.c.bf16 %v3495_v23, %v3493_v0  ;;  %v1703_v11 = vadd.f32 %v1702_v39, %v1654_v32 }
 0x545   :  { %v1785_v1 = vpop.f32.mrf.mxu0 }
 0x546   :  { %v1786_v44 = vadd.f32 %v1785_v1, %v3437_v59  ;;  %v1693_v59 = vadd.f32 %v1692_v40, %v1644_v55 }
 0x548   :  { %v1829_v27 = vmul.f32 0.01, %v1786_v44  ;;  %vm1813_vm0 = vcmp.ge.f32.partialorder %v1786_v44, 0.0  ;;  %v1742_v14 = vadd.f32 %v1741_v63, %v1693_v59 }
 0x54a   :  { %v3504_v60 = vsel %vm1813_vm0, %v1786_v44, %v1829_v27  ;;  %v1751_v44 = vpop.f32.mrf.mxu1  ;;  %v1704_v27 = vpop.f32.mrf.mxu2 }
 0x54d   :  { %v1787_v45 = vpop.f32.mrf.mxu0 }
 0x54e   :  { %v1788_v15 = vadd.f32 %v1787_v45, %v1739_v6 }
 0x550   :  { %vm1814_vm12 = vcmp.ge.f32.partialorder %v1788_v15, 0.0  ;;  %v1830_v5 = vmul.f32 0.01, %v1788_v15 }
 0x552   :  { %v3506_v48 = vsel %vm1814_vm12, %v1788_v15, %v1830_v5  ;;  %v1752_v15 = vadd.f32 %v1751_v44, %v1703_v11  ;;  %v1753_v12 = vpop.f32.mrf.mxu1  ;;  %v1705_v5 = vadd.f32 %v1704_v27, %v1656_v47 }
 0x553   :  { %v1859_v21 = vpack.c.bf16 %v3506_v48, %v3504_v60 }
 0x554   :  { %v1754_v55 = vadd.f32 %v1753_v12, %v1705_v5 }
 0x555   :  { %v1790_v34 = vpop.f32.mrf.mxu0 }
 0x556   :  { %v1791_v10 = vadd.f32 %v1790_v34, %v1742_v14 }
 0x558   :  { %v1831_v43 = vmul.f32 0.01, %v1791_v10  ;;  %vm1815_vm13 = vcmp.ge.f32.partialorder %v1791_v10, 0.0 }
 0x55a   :  { %v1847_v56 = vsel %vm1815_vm13, %v1791_v10, %v1831_v43 }
 0x55d   :  { %v1792_v28 = vpop.f32.mrf.mxu0 }
 0x55e   :  { %v1793_v51 = vadd.f32 %v1792_v28, %v1744_v57 }
 0x560   :  { %vm1816_vm14 = vcmp.ge.f32.partialorder %v1793_v51, 0.0  ;;  %v1832_v50 = vmul.f32 0.01, %v1793_v51 }
 0x562   :  { %v1848_v8 = vsel %vm1816_vm14, %v1793_v51, %v1832_v50 }
 0x563   :  { %v1860_v22 = vpack.c.bf16 %v1848_v8, %v1847_v56 }
 0x565   :  { %v1795_v53 = vpop.f32.mrf.mxu0 }
 0x566   :  { %v1796_v24 = vadd.f32 %v1795_v53, %v1747_v33 }
 0x568   :  { %v1833_v1 = vmul.f32 0.01, %v1796_v24  ;;  %vm1817_vm15 = vcmp.ge.f32.partialorder %v1796_v24, 0.0 }
 0x56a   :  { %v1849_v63 = vsel %vm1817_vm15, %v1796_v24, %v1833_v1 }
 0x56d   :  { %v1797_v40 = vpop.f32.mrf.mxu0 }
 0x56e   :  { %v1798_v26 = vadd.f32 %v1797_v40, %v1749_v38 }
 0x570   :  { %vm1818_vm1 = vcmp.ge.f32.partialorder %v1798_v26, 0.0  ;;  %v1834_v3 = vmul.f32 0.01, %v1798_v26 }
 0x572   :  { %v1850_v36 = vsel %vm1818_vm1, %v1798_v26, %v1834_v3 }
 0x573   :  { %v1861_v6 = vpack.c.bf16 %v1850_v36, %v1849_v63 }
 0x575   :  { %v1800_v45 = vpop.f32.mrf.mxu0 }
 0x576   :  { %v1801_v19 = vadd.f32 %v1800_v45, %v1752_v15 }
 0x578   :  { %v1835_v48 = vmul.f32 0.01, %v1801_v19  ;;  %vm1819_vm2 = vcmp.ge.f32.partialorder %v1801_v19, 0.0 }
 0x57a   :  { %v1851_v16 = vsel %vm1819_vm2, %v1801_v19, %v1835_v48 }
 0x57d   :  { %v1802_v60 = vpop.f32.mrf.mxu0 }
 0x57e   :  { %v1803_v34 = vadd.f32 %v1802_v60, %v1754_v55 }
 0x580   :  { %vm1820_vm3 = vcmp.ge.f32.partialorder %v1803_v34, 0.0  ;;  %v1836_v29 = vmul.f32 0.01, %v1803_v34 }
 0x582   :  { %v1852_v59 = vsel %vm1820_vm3, %v1803_v34, %v1836_v29 }
 0x583   :  { %v1862_v37 = vpack.c.bf16 %v1852_v59, %v1851_v16 }
 0x585   :  { %1881 = vmatpush.bf16.msra.mxu2 %v1862_v37 }
 0x589   :  { %1882 = vmatpush.bf16.msra.mxu2 %v1861_v6 }
 0x58d   :  { %1883 = vmatpush.bf16.msra.mxu2 %v1860_v22 }
 0x591   :  { %1884 = vmatpush.bf16.msra.mxu2 %v1859_v21 }
 0x595   :  { %1885 = vmatpush.bf16.msra.mxu2 %v1858_v30 }
 0x599   :  { %1886 = vmatpush.bf16.msra.mxu2 %v1857_v46 }
 0x59d   :  { %1887 = vmatpush.bf16.msra.mxu2 %v1856_v61 }
 0x5a1   :  { %1888 = vmatpush.bf16.msra.mxu2 %v1855_v54 }
 0x5a4   :  { %1889 = vmatmul.bf16.vlgmr.msra.gmra.mxu2 %v2319_v49 }
 0x627   :  { %v1890_v0 = vpop.f32.mrf.mxu2 }
 0x628   :  { %v1891_v23 = vadd.f32 %v1890_v0, %v1868_v25 }
 0x62a   :  { %vm1895_vm4 = vcmp.ge.f32.partialorder %v1891_v23, 0.0  ;;  %v1897_v30 = vmul.f32 0.01, %v1891_v23 }
 0x62c   :  { %v1899_v17 = vsel %vm1895_vm4, %v1891_v23, %v1897_v30 }
 0x62d   :  { %1901 = vst [vmem:[#allocation2] sm:$0xff] %v1899_v17 }
 0x62f   :  { %v1892_v46 = vpop.f32.mrf.mxu2 }
 0x630   :  { %v1893_v35 = vadd.f32 %v1892_v46, %v1873_v13 }
 0x632   :  { %vm1896_vm5 = vcmp.ge.f32.partialorder %v1893_v35, 0.0  ;;  %v1898_v52 = vmul.f32 0.01, %v1893_v35 }
 0x634   :  { %v1900_v62 = vsel %vm1896_vm5, %v1893_v35, %v1898_v52 }
 0x635   :  { %1902 = vst [vmem:[#allocation2 + $0x8] sm:$0xff] %v1900_v62 }
 0x636   :  { %1915 = dma.vmem_to_hbm [thread:$0]  %s1908_s20, 256, %s1910_s11, [#allocation3], %s2357_s5, %s2357_s5, %s2358_s23  }
 0x637   :  { %2353 = dma.done.wait [#allocation3], 256  }
 0x638   :  { %2354 = vsyncadd [#allocation3], 4294967040 }
 0x639   :  { %1920 = vsyncpa [#allocation3], 1 }

</bundles_post_ra>
